<compile_context>
chip_gen: v6e
topology: v6e:2x2x1
jax: 0.10.0
libtpu: 0.0.40
codegen_flags: <defaults>
</compile_context>

<pallas_src>
import functools
import math

import jax
import jax.numpy as jnp
from jax import lax
from jax.experimental import pallas as pl
from jax.experimental.pallas import tpu as pltpu


# ---------------------------------------------------------------------------
# Pallas kernel: full BaseNet4a forward for one batch tile.
# ---------------------------------------------------------------------------
def basenet4a_kernel(
    x_ref,                         # (Bt, x_dim)            f32
    w0a_ref, b0a_ref,              # (x_dim, h/2), (1, h/2)  layer0a (x_scale folded)
    w0bs_ref, w0bc_ref, b0b_ref,   # (h/2, h) x2, (1, h)     layer0b (split rows)
    was_ref, wac_ref, ba_ref,      # (L, h/2, h/2) x2, (L,1,h/2)  layer1a (alpha folded)
    wbs_ref, wbc_ref, bb_ref,      # (L, h/2, h) x2, (L,1,h)      layer1b (split rows)
    w2_ref,                        # (h, Yp)  layer2, gamma folded, lane-padded
    out_ref,                       # (Bt, Yp)
    *, n_layers, unroll_layers):
    f32 = jnp.float32
    wdt = w0bs_ref.dtype            # MXU input dtype (bf16 in perf mode, f32 otherwise)
    x = x_ref[...].astype(f32)
    x_dim = x.shape[1]

    # ---- layer0a: SinCos(x_dim, h, x_scale, is_first=True) -----------------
    if x_dim <= 4:
        # Tiny contraction dim: broadcasted FMAs on the VPU instead of a
        # >95%-padded MXU tile.
        w0a = w0a_ref[...].astype(f32)                        # (x_dim, h/2)
        z = b0a_ref[...] + x[:, 0:1] * w0a[0:1, :]
        for k in range(1, x_dim):
            z = z + x[:, k:k + 1] * w0a[k:k + 1, :]
    else:
        z = (jnp.dot(x.astype(wdt), w0a_ref[...], preferred_element_type=f32)
             + b0a_ref[...])
    xs, xc = jnp.sin(z), jnp.cos(z)        # halves of x0 = [sin(z), cos(z)]

    # ---- layer0b: Linear(h, h) on x0, in split-weight form ------------------
    x1 = (jnp.dot(xs.astype(wdt), w0bs_ref[...], preferred_element_type=f32)
          + jnp.dot(xc.astype(wdt), w0bc_ref[...], preferred_element_type=f32)
          + b0b_ref[...])

    # ---- n_layers of:  xx = SinCos(xx);  x1 = x1 + Linear(xx) ---------------
    def layer(wa_s, wa_c, b_a, wb_s, wb_c, b_b, xs, xc, x1):
        z = (jnp.dot(xs.astype(wdt), wa_s, preferred_element_type=f32)
             + jnp.dot(xc.astype(wdt), wa_c, preferred_element_type=f32)
             + b_a)
        xs, xc = jnp.sin(z), jnp.cos(z)
        x1 = x1 + (jnp.dot(xs.astype(wdt), wb_s, preferred_element_type=f32)
                   + jnp.dot(xc.astype(wdt), wb_c, preferred_element_type=f32)
                   + b_b)
        return xs, xc, x1

    if n_layers <= unroll_layers:
        # Small L: static unroll (everything stays in vregs).
        for n in range(n_layers):
            xs, xc, x1 = layer(was_ref[n], wac_ref[n], ba_ref[n],
                               wbs_ref[n], wbc_ref[n], bb_ref[n], xs, xc, x1)
    else:
        # Large L: fori_loop with dynamic VMEM-ref indexing keeps vreg
        # pressure flat and avoids instruction-stream blowup.
        def body(n, carry):
            xs, xc, x1 = carry
            return layer(was_ref[n], wac_ref[n], ba_ref[n],
                         wbs_ref[n], wbc_ref[n], bb_ref[n], xs, xc, x1)
        xs, xc, x1 = lax.fori_loop(0, n_layers, body, (xs, xc, x1), unroll=2)

    # ---- layer2: Linear(h, y_dim); bias is exactly zero in the module -------
    out_ref[...] = jnp.dot(x1.astype(wdt), w2_ref[...],
                           preferred_element_type=f32).astype(out_ref.dtype)


# ---------------------------------------------------------------------------
# pallas_call wrapper (built twice only if pl.Buffered(1) is unsupported).
# ---------------------------------------------------------------------------
def _run_pallas(x, kparams, *, n_layers, block_b, y_pad, vmem_limit,
                single_buffer_weights):
    Bp, x_dim = x.shape
    grid = (Bp // block_b,)

    def weight_spec(arr):
        nd = arr.ndim
        kwargs = {}
        if single_buffer_weights:
            # Grid-invariant input: 1 buffer instead of 2 halves weight VMEM.
            kwargs["pipeline_mode"] = pl.Buffered(1)
        return pl.BlockSpec(arr.shape, lambda i, _nd=nd: (0,) * _nd, **kwargs)

    kernel = functools.partial(basenet4a_kernel, n_layers=n_layers,
                               unroll_layers=4)

    return pl.pallas_call(
        kernel,
        out_shape=jax.ShapeDtypeStruct((Bp, y_pad), jnp.float32),
        grid_spec=pltpu.PrefetchScalarGridSpec(
            num_scalar_prefetch=0,
            grid=grid,
            in_specs=[pl.BlockSpec((block_b, x_dim), lambda i: (i, 0))]
                     + [weight_spec(a) for a in kparams],
            out_specs=pl.BlockSpec((block_b, y_pad), lambda i: (i, 0)),
        ),
        compiler_params=pltpu.CompilerParams(
            dimension_semantics=("parallel",),
            vmem_limit_bytes=vmem_limit,
        ),
    )(x, *kparams)


def basenet4a_forward(x, kparams, *, n_layers, y_dim, block_b=None):
    B, x_dim = x.shape
    y_pad = 128 * pl.cdiv(y_dim, 128)      # lane-dense output width
    h = kparams[2].shape[1]                # w0bs is (h/2, h)

    # Batch tile: ensure >= 2 grid steps for B > 8 so the ("parallel",) batch
    # axis can be sharded over v7x's 2 TensorCores; 256-row tiles for large B.
    # TODO(synk): sweep block_b upward (512/768/1024) for very large batches.
    if block_b is None:
        if B > 8:
            block_b = min(256, 8 * pl.cdiv(B, 16))
        else:
            block_b = 8 * pl.cdiv(B, 8)
    Bp = block_b * pl.cdiv(B, block_b)
    if Bp != B:
        x = jnp.pad(x, ((0, Bp - B), (0, 0)))

    # VMEM budget: single-buffered weights + double-buffered x/out tiles +
    # live activations, capped at ~7/8 of the chip's physical VMEM
    # (≈112 MiB on v5e/v6e, ≈56 MiB per-TC on v7x).
    weight_bytes = sum(int(a.size) * a.dtype.itemsize for a in kparams)
    act_bytes = 8 * block_b * max(h, y_pad) * 4
    io_bytes = 2 * block_b * (x_dim + y_pad) * 4
    needed = weight_bytes + act_bytes + io_bytes + (4 << 20)
    try:
        vmem_cap = int(pltpu.get_tpu_info().vmem_capacity_bytes)
    except Exception:
        vmem_cap = 64 << 20                # conservative (v7x per-TC)
    vmem_limit = max(32 << 20, min(needed, vmem_cap * 7 // 8))

    common = dict(n_layers=n_layers, block_b=block_b, y_pad=y_pad,
                  vmem_limit=vmem_limit)
    try:
        out = _run_pallas(x, kparams, single_buffer_weights=True, **common)
    except Exception:
        # TODO(synk): pl.Buffered(1) unsupported on this jax build — fall back
        # to default double-buffered weight specs.
        out = _run_pallas(x, kparams, single_buffer_weights=False, **common)
    return out[:B, :y_dim]


# ---------------------------------------------------------------------------
# Deterministic parameter init in PyTorch layout (mirrors the module's init).
# ---------------------------------------------------------------------------
def init_torch_params(key, x_dim, h_dim, n_layers, x_scale, alpha, gamma, y_dim):
    assert h_dim % 2 == 0
    h, h2 = h_dim, h_dim // 2
    it = iter(jax.random.split(key, 12))

    def u(k, shape, bound):
        return jax.random.uniform(k, shape, jnp.float32, -bound, bound)

    inv_sx = 1.0 / math.sqrt(x_dim)
    inv_sh = 1.0 / math.sqrt(h)
    tp = {}
    # layer0a: SinCos(x_dim, h, x_scale, is_first=True): weight U(-1/in, 1/in).
    tp["w0a"] = u(next(it), (h2, x_dim), 1.0 / x_dim)
    tp["b0a"] = u(next(it), (h2,), inv_sx)
    # layer0b: default nn.Linear(h, h).
    tp["w0b"] = u(next(it), (h, h), inv_sh)
    tp["b0b"] = u(next(it), (h,), inv_sh)
    # layer1a: n_layers SinCos(h, h, alpha, is_first=False).
    tp["wa"] = u(next(it), (n_layers, h2, h), math.sqrt(6.0 / h) / alpha)
    tp["ba"] = u(next(it), (n_layers, h2), inv_sh)
    # layer1b: n_layers default nn.Linear(h, h).
    tp["wb"] = u(next(it), (n_layers, h, h), inv_sh)
    tp["bb"] = u(next(it), (n_layers, h), inv_sh)
    # layer2: nn.Linear(h, y_dim); weight *= gamma, bias zeroed.
    tp["w2"] = u(next(it), (y_dim, h), inv_sh) * gamma
    tp["b2"] = jnp.zeros((y_dim,), jnp.float32)
    return tp


# ---------------------------------------------------------------------------
# Host-side conversion: transpose, fold scales, split sin/cos rows, lane-pad,
# and cast weights to the MXU dtype (biases stay f32).
# ---------------------------------------------------------------------------
def torch_to_kernel_params(tp, *, x_scale, alpha, y_dim, mxu_dtype=jnp.bfloat16):
    if not bool(jnp.all(tp["b2"] == 0)):
        raise ValueError("kernel drops layer2 bias; module's bias*=0 invariant violated")

    h2 = tp["w0a"].shape[0]
    y_pad = 128 * pl.cdiv(y_dim, 128)

    w0a = (x_scale * tp["w0a"]).T             # (x_dim, h/2), x_scale folded
    b0a = tp["b0a"][None, :]                  # (1, h/2)

    w0bT = tp["w0b"].T                        # (h, h)
    w0bs, w0bc = w0bT[:h2], w0bT[h2:]         # (h/2, h) each
    b0b = tp["b0b"][None, :]                  # (1, h)

    waT = alpha * jnp.transpose(tp["wa"], (0, 2, 1))   # (L, h, h/2), alpha folded
    was, wac = waT[:, :h2, :], waT[:, h2:, :]          # (L, h/2, h/2) each
    ba = tp["ba"][:, None, :]                          # (L, 1, h/2)

    wbT = jnp.transpose(tp["wb"], (0, 2, 1))           # (L, h, h)
    wbs, wbc = wbT[:, :h2, :], wbT[:, h2:, :]          # (L, h/2, h) each
    bb = tp["bb"][:, None, :]                          # (L, 1, h)

    w2 = tp["w2"].T                                    # (h, y_dim), gamma already in
    w2p = jnp.pad(w2, ((0, 0), (0, y_pad - y_dim)))    # (h, Yp) lane-padded

    wd = mxu_dtype
    return (w0a.astype(wd), b0a,
            w0bs.astype(wd), w0bc.astype(wd), b0b,
            was.astype(wd), wac.astype(wd), ba,
            wbs.astype(wd), wbc.astype(wd), bb,
            w2p.astype(wd))


# ---------------------------------------------------------------------------
# Plain-JAX reference (literal translation of the PyTorch forward).
# ---------------------------------------------------------------------------
def reference_forward(x, tp, *, x_scale, alpha, n_layers):
    def sincos(v, W, b, scale):
        z = (scale * v) @ W.T + b
        return jnp.concatenate([jnp.sin(z), jnp.cos(z)], axis=-1)

    x0 = sincos(x, tp["w0a"], tp["b0a"], x_scale)
    x1 = x0 @ tp["w0b"].T + tp["b0b"]
    xx = x0
    for n in range(n_layers):
        xx = sincos(xx, tp["wa"][n], tp["ba"][n], alpha)
        x1 = x1 + xx @ tp["wb"][n].T + tp["bb"][n]
    return x1 @ tp["w2"].T + tp["b2"]


if __name__ == "__main__":
    # Small shapes consistent with the module.
    x_dim, h_dim, n_layers, y_dim = 3, 32, 2, 4
    x_scale, alpha, gamma = 1.5, 2.0, 0.1
    B = 16

    key = jax.random.PRNGKey(0)
    kx, kp = jax.random.split(key)
    x = jax.random.uniform(kx, (B, x_dim), jnp.float32, -1.0, 1.0)

    tp = init_torch_params(kp, x_dim, h_dim, n_layers, x_scale, alpha, gamma, y_dim)
    y_ref = reference_forward(x, tp, x_scale=x_scale, alpha=alpha, n_layers=n_layers)

    # f32 MXU path: strict numerical check against the plain-JAX reference.
    kp_f32 = torch_to_kernel_params(tp, x_scale=x_scale, alpha=alpha,
                                    y_dim=y_dim, mxu_dtype=jnp.float32)
    y_f32 = jax.block_until_ready(
        basenet4a_forward(x, kp_f32, n_layers=n_layers, y_dim=y_dim))
    assert y_f32.shape == (B, y_dim)
    assert jnp.allclose(y_f32, y_ref, rtol=1e-3, atol=1e-3), "f32 kernel mismatch"

    # bf16-weight MXU path (default perf mode): looser tolerance for the
    # bf16 weight/activation quantization (f32 accumulation throughout).
    kp_bf16 = torch_to_kernel_params(tp, x_scale=x_scale, alpha=alpha, y_dim=y_dim)
    y_bf16 = jax.block_until_ready(
        basenet4a_forward(x, kp_bf16, n_layers=n_layers, y_dim=y_dim))
    assert y_bf16.shape == (B, y_dim)
    assert jnp.allclose(y_bf16, y_ref, rtol=5e-2, atol=2e-2), "bf16 kernel mismatch"

    print("KERNEL_OK")
</pallas_src>

<mosaic_0001>
module attributes {stable_mosaic.version = 11 : i64} {
  func.func @basenet4a_kernel(%arg0: i32, %arg1: memref<8x3xf32, #tpu.memory_space<vmem>>, %arg2: memref<3x16xf32, #tpu.memory_space<vmem>>, %arg3: memref<1x16xf32, #tpu.memory_space<vmem>>, %arg4: memref<16x32xf32, #tpu.memory_space<vmem>>, %arg5: memref<16x32xf32, #tpu.memory_space<vmem>>, %arg6: memref<1x32xf32, #tpu.memory_space<vmem>>, %arg7: memref<2x16x16xf32, #tpu.memory_space<vmem>>, %arg8: memref<2x16x16xf32, #tpu.memory_space<vmem>>, %arg9: memref<2x1x16xf32, #tpu.memory_space<vmem>>, %arg10: memref<2x16x32xf32, #tpu.memory_space<vmem>>, %arg11: memref<2x16x32xf32, #tpu.memory_space<vmem>>, %arg12: memref<2x1x32xf32, #tpu.memory_space<vmem>>, %arg13: memref<32x128xf32, #tpu.memory_space<vmem>>, %arg14: memref<8x128xf32, #tpu.memory_space<vmem>>) attributes {dimension_semantics = [#tpu.dimension_semantics<parallel>], iteration_bounds = array<i64: 2>, scalar_prefetch = 0 : i64, scratch_operands = 0 : i64, tpu.core_type = #tpu.core_type<tc>, window_params = [{transform_indices = @transform_0, window_bounds = array<i64: 8, 3>}, {pipeline_mode = #tpu.pipeline_mode<synchronous>, transform_indices = @transform_1, window_bounds = array<i64: 3, 16>}, {pipeline_mode = #tpu.pipeline_mode<synchronous>, transform_indices = @transform_2, window_bounds = array<i64: 1, 16>}, {pipeline_mode = #tpu.pipeline_mode<synchronous>, transform_indices = @transform_3, window_bounds = array<i64: 16, 32>}, {pipeline_mode = #tpu.pipeline_mode<synchronous>, transform_indices = @transform_4, window_bounds = array<i64: 16, 32>}, {pipeline_mode = #tpu.pipeline_mode<synchronous>, transform_indices = @transform_5, window_bounds = array<i64: 1, 32>}, {pipeline_mode = #tpu.pipeline_mode<synchronous>, transform_indices = @transform_6, window_bounds = array<i64: 2, 16, 16>}, {pipeline_mode = #tpu.pipeline_mode<synchronous>, transform_indices = @transform_7, window_bounds = array<i64: 2, 16, 16>}, {pipeline_mode = #tpu.pipeline_mode<synchronous>, transform_indices = @transform_8, window_bounds = array<i64: 2, 1, 16>}, {pipeline_mode = #tpu.pipeline_mode<synchronous>, transform_indices = @transform_9, window_bounds = array<i64: 2, 16, 32>}, {pipeline_mode = #tpu.pipeline_mode<synchronous>, transform_indices = @transform_10, window_bounds = array<i64: 2, 16, 32>}, {pipeline_mode = #tpu.pipeline_mode<synchronous>, transform_indices = @transform_11, window_bounds = array<i64: 2, 1, 32>}, {pipeline_mode = #tpu.pipeline_mode<synchronous>, transform_indices = @transform_12, window_bounds = array<i64: 32, 128>}, {transform_indices = @transform_13, window_bounds = array<i64: 8, 128>}]} {
    %c0 = arith.constant 0 : index
    %c0_0 = arith.constant 0 : index
    %0 = vector.load %arg1[%c0, %c0_0] : memref<8x3xf32, #tpu.memory_space<vmem>>, vector<8x3xf32>
    %c0_1 = arith.constant 0 : index
    %c0_2 = arith.constant 0 : index
    %1 = vector.load %arg2[%c0_1, %c0_2] : memref<3x16xf32, #tpu.memory_space<vmem>>, vector<3x16xf32>
    %c0_3 = arith.constant 0 : index
    %c0_4 = arith.constant 0 : index
    %2 = vector.load %arg3[%c0_3, %c0_4] : memref<1x16xf32, #tpu.memory_space<vmem>>, vector<1x16xf32>
    %3 = vector.extract_strided_slice %0 {offsets = [0, 0], sizes = [8, 1], strides = [1, 1]} : vector<8x3xf32> to vector<8x1xf32>
    %4 = vector.extract_strided_slice %1 {offsets = [0, 0], sizes = [1, 16], strides = [1, 1]} : vector<3x16xf32> to vector<1x16xf32>
    %5 = vector.broadcast %3 : vector<8x1xf32> to vector<8x16xf32>
    %6 = vector.broadcast %4 : vector<1x16xf32> to vector<8x16xf32>
    %7 = arith.mulf %5, %6 : vector<8x16xf32>
    %8 = vector.broadcast %2 : vector<1x16xf32> to vector<8x16xf32>
    %9 = arith.addf %8, %7 : vector<8x16xf32>
    %10 = vector.extract_strided_slice %0 {offsets = [0, 1], sizes = [8, 1], strides = [1, 1]} : vector<8x3xf32> to vector<8x1xf32>
    %11 = vector.extract_strided_slice %1 {offsets = [1, 0], sizes = [1, 16], strides = [1, 1]} : vector<3x16xf32> to vector<1x16xf32>
    %12 = vector.broadcast %10 : vector<8x1xf32> to vector<8x16xf32>
    %13 = vector.broadcast %11 : vector<1x16xf32> to vector<8x16xf32>
    %14 = arith.mulf %12, %13 : vector<8x16xf32>
    %15 = arith.addf %9, %14 : vector<8x16xf32>
    %16 = vector.extract_strided_slice %0 {offsets = [0, 2], sizes = [8, 1], strides = [1, 1]} : vector<8x3xf32> to vector<8x1xf32>
    %17 = vector.extract_strided_slice %1 {offsets = [2, 0], sizes = [1, 16], strides = [1, 1]} : vector<3x16xf32> to vector<1x16xf32>
    %18 = vector.broadcast %16 : vector<8x1xf32> to vector<8x16xf32>
    %19 = vector.broadcast %17 : vector<1x16xf32> to vector<8x16xf32>
    %20 = arith.mulf %18, %19 : vector<8x16xf32>
    %21 = arith.addf %15, %20 : vector<8x16xf32>
    %22 = math.sin %21 : vector<8x16xf32>
    %23 = math.cos %21 : vector<8x16xf32>
    %c0_5 = arith.constant 0 : index
    %c0_6 = arith.constant 0 : index
    %24 = vector.load %arg4[%c0_5, %c0_6] : memref<16x32xf32, #tpu.memory_space<vmem>>, vector<16x32xf32>
    %cst = arith.constant dense<0.000000e+00> : vector<8x32xf32>
    %25 = tpu.matmul %22, %24, %cst {dimension_numbers = #tpu.dot_dimension_numbers<[1], [0], [0], [1], [0, 0, 1, 1], [], []>} : vector<8x16xf32>, vector<16x32xf32>, vector<8x32xf32> -> vector<8x32xf32>
    %c0_7 = arith.constant 0 : index
    %c0_8 = arith.constant 0 : index
    %26 = vector.load %arg5[%c0_7, %c0_8] : memref<16x32xf32, #tpu.memory_space<vmem>>, vector<16x32xf32>
    %cst_9 = arith.constant dense<0.000000e+00> : vector<8x32xf32>
    %27 = tpu.matmul %23, %26, %cst_9 {dimension_numbers = #tpu.dot_dimension_numbers<[1], [0], [0], [1], [0, 0, 1, 1], [], []>} : vector<8x16xf32>, vector<16x32xf32>, vector<8x32xf32> -> vector<8x32xf32>
    %28 = arith.addf %25, %27 : vector<8x32xf32>
    %c0_10 = arith.constant 0 : index
    %c0_11 = arith.constant 0 : index
    %29 = vector.load %arg6[%c0_10, %c0_11] : memref<1x32xf32, #tpu.memory_space<vmem>>, vector<1x32xf32>
    %30 = vector.broadcast %29 : vector<1x32xf32> to vector<8x32xf32>
    %31 = arith.addf %28, %30 : vector<8x32xf32>
    %c0_12 = arith.constant 0 : index
    %c0_13 = arith.constant 0 : index
    %c0_14 = arith.constant 0 : index
    %32 = vector.load %arg7[%c0_12, %c0_13, %c0_14] : memref<2x16x16xf32, #tpu.memory_space<vmem>>, vector<1x16x16xf32>
    %33 = vector.shape_cast %32 : vector<1x16x16xf32> to vector<16x16xf32>
    %c0_15 = arith.constant 0 : index
    %c0_16 = arith.constant 0 : index
    %c0_17 = arith.constant 0 : index
    %34 = vector.load %arg8[%c0_15, %c0_16, %c0_17] : memref<2x16x16xf32, #tpu.memory_space<vmem>>, vector<1x16x16xf32>
    %35 = vector.shape_cast %34 : vector<1x16x16xf32> to vector<16x16xf32>
    %c0_18 = arith.constant 0 : index
    %c0_19 = arith.constant 0 : index
    %c0_20 = arith.constant 0 : index
    %36 = vector.load %arg9[%c0_18, %c0_19, %c0_20] : memref<2x1x16xf32, #tpu.memory_space<vmem>>, vector<1x1x16xf32>
    %37 = vector.shape_cast %36 : vector<1x1x16xf32> to vector<1x16xf32>
    %c0_21 = arith.constant 0 : index
    %c0_22 = arith.constant 0 : index
    %c0_23 = arith.constant 0 : index
    %38 = vector.load %arg10[%c0_21, %c0_22, %c0_23] : memref<2x16x32xf32, #tpu.memory_space<vmem>>, vector<1x16x32xf32>
    %39 = vector.shape_cast %38 : vector<1x16x32xf32> to vector<16x32xf32>
    %c0_24 = arith.constant 0 : index
    %c0_25 = arith.constant 0 : index
    %c0_26 = arith.constant 0 : index
    %40 = vector.load %arg11[%c0_24, %c0_25, %c0_26] : memref<2x16x32xf32, #tpu.memory_space<vmem>>, vector<1x16x32xf32>
    %41 = vector.shape_cast %40 : vector<1x16x32xf32> to vector<16x32xf32>
    %c0_27 = arith.constant 0 : index
    %c0_28 = arith.constant 0 : index
    %c0_29 = arith.constant 0 : index
    %42 = vector.load %arg12[%c0_27, %c0_28, %c0_29] : memref<2x1x32xf32, #tpu.memory_space<vmem>>, vector<1x1x32xf32>
    %43 = vector.shape_cast %42 : vector<1x1x32xf32> to vector<1x32xf32>
    %cst_30 = arith.constant dense<0.000000e+00> : vector<8x16xf32>
    %44 = tpu.matmul %22, %33, %cst_30 {dimension_numbers = #tpu.dot_dimension_numbers<[1], [0], [0], [1], [0, 0, 1, 1], [], []>} : vector<8x16xf32>, vector<16x16xf32>, vector<8x16xf32> -> vector<8x16xf32>
    %cst_31 = arith.constant dense<0.000000e+00> : vector<8x16xf32>
    %45 = tpu.matmul %23, %35, %cst_31 {dimension_numbers = #tpu.dot_dimension_numbers<[1], [0], [0], [1], [0, 0, 1, 1], [], []>} : vector<8x16xf32>, vector<16x16xf32>, vector<8x16xf32> -> vector<8x16xf32>
    %46 = arith.addf %44, %45 : vector<8x16xf32>
    %47 = vector.broadcast %37 : vector<1x16xf32> to vector<8x16xf32>
    %48 = arith.addf %46, %47 : vector<8x16xf32>
    %49 = math.sin %48 : vector<8x16xf32>
    %50 = math.cos %48 : vector<8x16xf32>
    %cst_32 = arith.constant dense<0.000000e+00> : vector<8x32xf32>
    %51 = tpu.matmul %49, %39, %cst_32 {dimension_numbers = #tpu.dot_dimension_numbers<[1], [0], [0], [1], [0, 0, 1, 1], [], []>} : vector<8x16xf32>, vector<16x32xf32>, vector<8x32xf32> -> vector<8x32xf32>
    %cst_33 = arith.constant dense<0.000000e+00> : vector<8x32xf32>
    %52 = tpu.matmul %50, %41, %cst_33 {dimension_numbers = #tpu.dot_dimension_numbers<[1], [0], [0], [1], [0, 0, 1, 1], [], []>} : vector<8x16xf32>, vector<16x32xf32>, vector<8x32xf32> -> vector<8x32xf32>
    %53 = arith.addf %51, %52 : vector<8x32xf32>
    %54 = vector.broadcast %43 : vector<1x32xf32> to vector<8x32xf32>
    %55 = arith.addf %53, %54 : vector<8x32xf32>
    %56 = arith.addf %31, %55 : vector<8x32xf32>
    %c1 = arith.constant 1 : index
    %c0_34 = arith.constant 0 : index
    %c0_35 = arith.constant 0 : index
    %57 = vector.load %arg7[%c1, %c0_34, %c0_35] : memref<2x16x16xf32, #tpu.memory_space<vmem>>, vector<1x16x16xf32>
    %58 = vector.shape_cast %57 : vector<1x16x16xf32> to vector<16x16xf32>
    %c1_36 = arith.constant 1 : index
    %c0_37 = arith.constant 0 : index
    %c0_38 = arith.constant 0 : index
    %59 = vector.load %arg8[%c1_36, %c0_37, %c0_38] : memref<2x16x16xf32, #tpu.memory_space<vmem>>, vector<1x16x16xf32>
    %60 = vector.shape_cast %59 : vector<1x16x16xf32> to vector<16x16xf32>
    %c1_39 = arith.constant 1 : index
    %c0_40 = arith.constant 0 : index
    %c0_41 = arith.constant 0 : index
    %61 = vector.load %arg9[%c1_39, %c0_40, %c0_41] : memref<2x1x16xf32, #tpu.memory_space<vmem>>, vector<1x1x16xf32>
    %62 = vector.shape_cast %61 : vector<1x1x16xf32> to vector<1x16xf32>
    %c1_42 = arith.constant 1 : index
    %c0_43 = arith.constant 0 : index
    %c0_44 = arith.constant 0 : index
    %63 = vector.load %arg10[%c1_42, %c0_43, %c0_44] : memref<2x16x32xf32, #tpu.memory_space<vmem>>, vector<1x16x32xf32>
    %64 = vector.shape_cast %63 : vector<1x16x32xf32> to vector<16x32xf32>
    %c1_45 = arith.constant 1 : index
    %c0_46 = arith.constant 0 : index
    %c0_47 = arith.constant 0 : index
    %65 = vector.load %arg11[%c1_45, %c0_46, %c0_47] : memref<2x16x32xf32, #tpu.memory_space<vmem>>, vector<1x16x32xf32>
    %66 = vector.shape_cast %65 : vector<1x16x32xf32> to vector<16x32xf32>
    %c1_48 = arith.constant 1 : index
    %c0_49 = arith.constant 0 : index
    %c0_50 = arith.constant 0 : index
    %67 = vector.load %arg12[%c1_48, %c0_49, %c0_50] : memref<2x1x32xf32, #tpu.memory_space<vmem>>, vector<1x1x32xf32>
    %68 = vector.shape_cast %67 : vector<1x1x32xf32> to vector<1x32xf32>
    %cst_51 = arith.constant dense<0.000000e+00> : vector<8x16xf32>
    %69 = tpu.matmul %49, %58, %cst_51 {dimension_numbers = #tpu.dot_dimension_numbers<[1], [0], [0], [1], [0, 0, 1, 1], [], []>} : vector<8x16xf32>, vector<16x16xf32>, vector<8x16xf32> -> vector<8x16xf32>
    %cst_52 = arith.constant dense<0.000000e+00> : vector<8x16xf32>
    %70 = tpu.matmul %50, %60, %cst_52 {dimension_numbers = #tpu.dot_dimension_numbers<[1], [0], [0], [1], [0, 0, 1, 1], [], []>} : vector<8x16xf32>, vector<16x16xf32>, vector<8x16xf32> -> vector<8x16xf32>
    %71 = arith.addf %69, %70 : vector<8x16xf32>
    %72 = vector.broadcast %62 : vector<1x16xf32> to vector<8x16xf32>
    %73 = arith.addf %71, %72 : vector<8x16xf32>
    %74 = math.sin %73 : vector<8x16xf32>
    %75 = math.cos %73 : vector<8x16xf32>
    %cst_53 = arith.constant dense<0.000000e+00> : vector<8x32xf32>
    %76 = tpu.matmul %74, %64, %cst_53 {dimension_numbers = #tpu.dot_dimension_numbers<[1], [0], [0], [1], [0, 0, 1, 1], [], []>} : vector<8x16xf32>, vector<16x32xf32>, vector<8x32xf32> -> vector<8x32xf32>
    %cst_54 = arith.constant dense<0.000000e+00> : vector<8x32xf32>
    %77 = tpu.matmul %75, %66, %cst_54 {dimension_numbers = #tpu.dot_dimension_numbers<[1], [0], [0], [1], [0, 0, 1, 1], [], []>} : vector<8x16xf32>, vector<16x32xf32>, vector<8x32xf32> -> vector<8x32xf32>
    %78 = arith.addf %76, %77 : vector<8x32xf32>
    %79 = vector.broadcast %68 : vector<1x32xf32> to vector<8x32xf32>
    %80 = arith.addf %78, %79 : vector<8x32xf32>
    %81 = arith.addf %56, %80 : vector<8x32xf32>
    %c0_55 = arith.constant 0 : index
    %c0_56 = arith.constant 0 : index
    %82 = vector.load %arg13[%c0_55, %c0_56] : memref<32x128xf32, #tpu.memory_space<vmem>>, vector<32x128xf32>
    %cst_57 = arith.constant dense<0.000000e+00> : vector<8x128xf32>
    %83 = tpu.matmul %81, %82, %cst_57 {dimension_numbers = #tpu.dot_dimension_numbers<[1], [0], [0], [1], [0, 0, 1, 1], [], []>} : vector<8x32xf32>, vector<32x128xf32>, vector<8x128xf32> -> vector<8x128xf32>
    %c0_58 = arith.constant 0 : index
    %c0_59 = arith.constant 0 : index
    %84 = vector.load %arg14[%c0_58, %c0_59] : memref<8x128xf32, #tpu.memory_space<vmem>>, vector<8x128xf32>
    tpu.vector_store %arg14[%c0_58, %c0_59], %83 {strides = array<i32>} : memref<8x128xf32, #tpu.memory_space<vmem>>, vector<8x128xf32>,
    return
  }
  func.func @transform_0(%arg0: i32) -> (i32, i32) {
    %c0_i32 = arith.constant 0 : i32
    %c0_i32_0 = arith.constant 0 : i32
    return %arg0, %c0_i32 : i32, i32
  }
  func.func @transform_1(%arg0: i32) -> (i32, i32) {
    %c0_i32 = arith.constant 0 : i32
    %c0_i32_0 = arith.constant 0 : i32
    %c0_i32_1 = arith.constant 0 : i32
    return %c0_i32, %c0_i32_0 : i32, i32
  }
  func.func @transform_2(%arg0: i32) -> (i32, i32) {
    %c0_i32 = arith.constant 0 : i32
    %c0_i32_0 = arith.constant 0 : i32
    %c0_i32_1 = arith.constant 0 : i32
    return %c0_i32, %c0_i32_0 : i32, i32
  }
  func.func @transform_3(%arg0: i32) -> (i32, i32) {
    %c0_i32 = arith.constant 0 : i32
    %c0_i32_0 = arith.constant 0 : i32
    %c0_i32_1 = arith.constant 0 : i32
    return %c0_i32, %c0_i32_0 : i32, i32
  }
  func.func @transform_4(%arg0: i32) -> (i32, i32) {
    %c0_i32 = arith.constant 0 : i32
    %c0_i32_0 = arith.constant 0 : i32
    %c0_i32_1 = arith.constant 0 : i32
    return %c0_i32, %c0_i32_0 : i32, i32
  }
  func.func @transform_5(%arg0: i32) -> (i32, i32) {
    %c0_i32 = arith.constant 0 : i32
    %c0_i32_0 = arith.constant 0 : i32
    %c0_i32_1 = arith.constant 0 : i32
    return %c0_i32, %c0_i32_0 : i32, i32
  }
  func.func @transform_6(%arg0: i32) -> (i32, i32, i32) {
    %c0_i32 = arith.constant 0 : i32
    %c0_i32_0 = arith.constant 0 : i32
    %c0_i32_1 = arith.constant 0 : i32
    %c0_i32_2 = arith.constant 0 : i32
    return %c0_i32, %c0_i32_0, %c0_i32_1 : i32, i32, i32
  }
  func.func @transform_7(%arg0: i32) -> (i32, i32, i32) {
    %c0_i32 = arith.constant 0 : i32
    %c0_i32_0 = arith.constant 0 : i32
    %c0_i32_1 = arith.constant 0 : i32
    %c0_i32_2 = arith.constant 0 : i32
    return %c0_i32, %c0_i32_0, %c0_i32_1 : i32, i32, i32
  }
  func.func @transform_8(%arg0: i32) -> (i32, i32, i32) {
    %c0_i32 = arith.constant 0 : i32
    %c0_i32_0 = arith.constant 0 : i32
    %c0_i32_1 = arith.constant 0 : i32
    %c0_i32_2 = arith.constant 0 : i32
    return %c0_i32, %c0_i32_0, %c0_i32_1 : i32, i32, i32
  }
  func.func @transform_9(%arg0: i32) -> (i32, i32, i32) {
    %c0_i32 = arith.constant 0 : i32
    %c0_i32_0 = arith.constant 0 : i32
    %c0_i32_1 = arith.constant 0 : i32
    %c0_i32_2 = arith.constant 0 : i32
    return %c0_i32, %c0_i32_0, %c0_i32_1 : i32, i32, i32
  }
  func.func @transform_10(%arg0: i32) -> (i32, i32, i32) {
    %c0_i32 = arith.constant 0 : i32
    %c0_i32_0 = arith.constant 0 : i32
    %c0_i32_1 = arith.constant 0 : i32
    %c0_i32_2 = arith.constant 0 : i32
    return %c0_i32, %c0_i32_0, %c0_i32_1 : i32, i32, i32
  }
  func.func @transform_11(%arg0: i32) -> (i32, i32, i32) {
    %c0_i32 = arith.constant 0 : i32
    %c0_i32_0 = arith.constant 0 : i32
    %c0_i32_1 = arith.constant 0 : i32
    %c0_i32_2 = arith.constant 0 : i32
    return %c0_i32, %c0_i32_0, %c0_i32_1 : i32, i32, i32
  }
  func.func @transform_12(%arg0: i32) -> (i32, i32) {
    %c0_i32 = arith.constant 0 : i32
    %c0_i32_0 = arith.constant 0 : i32
    %c0_i32_1 = arith.constant 0 : i32
    return %c0_i32, %c0_i32_0 : i32, i32
  }
  func.func @transform_13(%arg0: i32) -> (i32, i32) {
    %c0_i32 = arith.constant 0 : i32
    %c0_i32_0 = arith.constant 0 : i32
    return %arg0, %c0_i32 : i32, i32
  }
}

module attributes {stable_mosaic.version = 11 : i64} {
  func.func @basenet4a_kernel(%arg0: i32, %arg1: memref<8x3xf32, #tpu.memory_space<vmem>>, %arg2: memref<3x16xf32, #tpu.memory_space<vmem>>, %arg3: memref<1x16xf32, #tpu.memory_space<vmem>>, %arg4: memref<16x32xf32, #tpu.memory_space<vmem>>, %arg5: memref<16x32xf32, #tpu.memory_space<vmem>>, %arg6: memref<1x32xf32, #tpu.memory_space<vmem>>, %arg7: memref<2x16x16xf32, #tpu.memory_space<vmem>>, %arg8: memref<2x16x16xf32, #tpu.memory_space<vmem>>, %arg9: memref<2x1x16xf32, #tpu.memory_space<vmem>>, %arg10: memref<2x16x32xf32, #tpu.memory_space<vmem>>, %arg11: memref<2x16x32xf32, #tpu.memory_space<vmem>>, %arg12: memref<2x1x32xf32, #tpu.memory_space<vmem>>, %arg13: memref<32x128xf32, #tpu.memory_space<vmem>>, %arg14: memref<8x128xf32, #tpu.memory_space<vmem>>) attributes {dimension_semantics = [#tpu.dimension_semantics<parallel>], iteration_bounds = array<i64: 2>, scalar_prefetch = 0 : i64, scratch_operands = 0 : i64, tpu.core_type = #tpu.core_type<tc>, window_params = [{transform_indices = @transform_0, window_bounds = array<i64: 8, 3>}, {pipeline_mode = #tpu.pipeline_mode<synchronous>, transform_indices = @transform_1, window_bounds = array<i64: 3, 16>}, {pipeline_mode = #tpu.pipeline_mode<synchronous>, transform_indices = @transform_2, window_bounds = array<i64: 1, 16>}, {pipeline_mode = #tpu.pipeline_mode<synchronous>, transform_indices = @transform_3, window_bounds = array<i64: 16, 32>}, {pipeline_mode = #tpu.pipeline_mode<synchronous>, transform_indices = @transform_4, window_bounds = array<i64: 16, 32>}, {pipeline_mode = #tpu.pipeline_mode<synchronous>, transform_indices = @transform_5, window_bounds = array<i64: 1, 32>}, {pipeline_mode = #tpu.pipeline_mode<synchronous>, transform_indices = @transform_6, window_bounds = array<i64: 2, 16, 16>}, {pipeline_mode = #tpu.pipeline_mode<synchronous>, transform_indices = @transform_7, window_bounds = array<i64: 2, 16, 16>}, {pipeline_mode = #tpu.pipeline_mode<synchronous>, transform_indices = @transform_8, window_bounds = array<i64: 2, 1, 16>}, {pipeline_mode = #tpu.pipeline_mode<synchronous>, transform_indices = @transform_9, window_bounds = array<i64: 2, 16, 32>}, {pipeline_mode = #tpu.pipeline_mode<synchronous>, transform_indices = @transform_10, window_bounds = array<i64: 2, 16, 32>}, {pipeline_mode = #tpu.pipeline_mode<synchronous>, transform_indices = @transform_11, window_bounds = array<i64: 2, 1, 32>}, {pipeline_mode = #tpu.pipeline_mode<synchronous>, transform_indices = @transform_12, window_bounds = array<i64: 32, 128>}, {transform_indices = @transform_13, window_bounds = array<i64: 8, 128>}]} {
    %c0 = arith.constant 0 : index
    %c0_0 = arith.constant 0 : index
    %0 = vector.load %arg1[%c0, %c0_0] : memref<8x3xf32, #tpu.memory_space<vmem>>, vector<8x3xf32>
    %c0_1 = arith.constant 0 : index
    %c0_2 = arith.constant 0 : index
    %1 = vector.load %arg2[%c0_1, %c0_2] : memref<3x16xf32, #tpu.memory_space<vmem>>, vector<3x16xf32>
    %c0_3 = arith.constant 0 : index
    %c0_4 = arith.constant 0 : index
    %2 = vector.load %arg3[%c0_3, %c0_4] : memref<1x16xf32, #tpu.memory_space<vmem>>, vector<1x16xf32>
    %3 = vector.extract_strided_slice %0 {offsets = [0, 0], sizes = [8, 1], strides = [1, 1]} : vector<8x3xf32> to vector<8x1xf32>
    %4 = vector.extract_strided_slice %1 {offsets = [0, 0], sizes = [1, 16], strides = [1, 1]} : vector<3x16xf32> to vector<1x16xf32>
    %5 = vector.broadcast %3 : vector<8x1xf32> to vector<8x16xf32>
    %6 = vector.broadcast %4 : vector<1x16xf32> to vector<8x16xf32>
    %7 = arith.mulf %5, %6 : vector<8x16xf32>
    %8 = vector.broadcast %2 : vector<1x16xf32> to vector<8x16xf32>
    %9 = arith.addf %8, %7 : vector<8x16xf32>
    %10 = vector.extract_strided_slice %0 {offsets = [0, 1], sizes = [8, 1], strides = [1, 1]} : vector<8x3xf32> to vector<8x1xf32>
    %11 = vector.extract_strided_slice %1 {offsets = [1, 0], sizes = [1, 16], strides = [1, 1]} : vector<3x16xf32> to vector<1x16xf32>
    %12 = vector.broadcast %10 : vector<8x1xf32> to vector<8x16xf32>
    %13 = vector.broadcast %11 : vector<1x16xf32> to vector<8x16xf32>
    %14 = arith.mulf %12, %13 : vector<8x16xf32>
    %15 = arith.addf %9, %14 : vector<8x16xf32>
    %16 = vector.extract_strided_slice %0 {offsets = [0, 2], sizes = [8, 1], strides = [1, 1]} : vector<8x3xf32> to vector<8x1xf32>
    %17 = vector.extract_strided_slice %1 {offsets = [2, 0], sizes = [1, 16], strides = [1, 1]} : vector<3x16xf32> to vector<1x16xf32>
    %18 = vector.broadcast %16 : vector<8x1xf32> to vector<8x16xf32>
    %19 = vector.broadcast %17 : vector<1x16xf32> to vector<8x16xf32>
    %20 = arith.mulf %18, %19 : vector<8x16xf32>
    %21 = arith.addf %15, %20 : vector<8x16xf32>
    %22 = math.sin %21 : vector<8x16xf32>
    %23 = math.cos %21 : vector<8x16xf32>
    %c0_5 = arith.constant 0 : index
    %c0_6 = arith.constant 0 : index
    %24 = vector.load %arg4[%c0_5, %c0_6] : memref<16x32xf32, #tpu.memory_space<vmem>>, vector<16x32xf32>
    %cst = arith.constant dense<0.000000e+00> : vector<8x32xf32>
    %25 = tpu.matmul %22, %24, %cst {dimension_numbers = #tpu.dot_dimension_numbers<[1], [0], [0], [1], [0, 0, 1, 1], [], []>} : vector<8x16xf32>, vector<16x32xf32>, vector<8x32xf32> -> vector<8x32xf32>
    %c0_7 = arith.constant 0 : index
    %c0_8 = arith.constant 0 : index
    %26 = vector.load %arg5[%c0_7, %c0_8] : memref<16x32xf32, #tpu.memory_space<vmem>>, vector<16x32xf32>
    %cst_9 = arith.constant dense<0.000000e+00> : vector<8x32xf32>
    %27 = tpu.matmul %23, %26, %cst_9 {dimension_numbers = #tpu.dot_dimension_numbers<[1], [0], [0], [1], [0, 0, 1, 1], [], []>} : vector<8x16xf32>, vector<16x32xf32>, vector<8x32xf32> -> vector<8x32xf32>
    %28 = arith.addf %25, %27 : vector<8x32xf32>
    %c0_10 = arith.constant 0 : index
    %c0_11 = arith.constant 0 : index
    %29 = vector.load %arg6[%c0_10, %c0_11] : memref<1x32xf32, #tpu.memory_space<vmem>>, vector<1x32xf32>
    %30 = vector.broadcast %29 : vector<1x32xf32> to vector<8x32xf32>
    %31 = arith.addf %28, %30 : vector<8x32xf32>
    %c0_12 = arith.constant 0 : index
    %c0_13 = arith.constant 0 : index
    %c0_14 = arith.constant 0 : index
    %32 = vector.load %arg7[%c0_12, %c0_13, %c0_14] : memref<2x16x16xf32, #tpu.memory_space<vmem>>, vector<1x16x16xf32>
    %33 = vector.shape_cast %32 : vector<1x16x16xf32> to vector<16x16xf32>
    %c0_15 = arith.constant 0 : index
    %c0_16 = arith.constant 0 : index
    %c0_17 = arith.constant 0 : index
    %34 = vector.load %arg8[%c0_15, %c0_16, %c0_17] : memref<2x16x16xf32, #tpu.memory_space<vmem>>, vector<1x16x16xf32>
    %35 = vector.shape_cast %34 : vector<1x16x16xf32> to vector<16x16xf32>
    %c0_18 = arith.constant 0 : index
    %c0_19 = arith.constant 0 : index
    %c0_20 = arith.constant 0 : index
    %36 = vector.load %arg9[%c0_18, %c0_19, %c0_20] : memref<2x1x16xf32, #tpu.memory_space<vmem>>, vector<1x1x16xf32>
    %37 = vector.shape_cast %36 : vector<1x1x16xf32> to vector<1x16xf32>
    %c0_21 = arith.constant 0 : index
    %c0_22 = arith.constant 0 : index
    %c0_23 = arith.constant 0 : index
    %38 = vector.load %arg10[%c0_21, %c0_22, %c0_23] : memref<2x16x32xf32, #tpu.memory_space<vmem>>, vector<1x16x32xf32>
    %39 = vector.shape_cast %38 : vector<1x16x32xf32> to vector<16x32xf32>
    %c0_24 = arith.constant 0 : index
    %c0_25 = arith.constant 0 : index
    %c0_26 = arith.constant 0 : index
    %40 = vector.load %arg11[%c0_24, %c0_25, %c0_26] : memref<2x16x32xf32, #tpu.memory_space<vmem>>, vector<1x16x32xf32>
    %41 = vector.shape_cast %40 : vector<1x16x32xf32> to vector<16x32xf32>
    %c0_27 = arith.constant 0 : index
    %c0_28 = arith.constant 0 : index
    %c0_29 = arith.constant 0 : index
    %42 = vector.load %arg12[%c0_27, %c0_28, %c0_29] : memref<2x1x32xf32, #tpu.memory_space<vmem>>, vector<1x1x32xf32>
    %43 = vector.shape_cast %42 : vector<1x1x32xf32> to vector<1x32xf32>
    %cst_30 = arith.constant dense<0.000000e+00> : vector<8x16xf32>
    %44 = tpu.matmul %22, %33, %cst_30 {dimension_numbers = #tpu.dot_dimension_numbers<[1], [0], [0], [1], [0, 0, 1, 1], [], []>} : vector<8x16xf32>, vector<16x16xf32>, vector<8x16xf32> -> vector<8x16xf32>
    %cst_31 = arith.constant dense<0.000000e+00> : vector<8x16xf32>
    %45 = tpu.matmul %23, %35, %cst_31 {dimension_numbers = #tpu.dot_dimension_numbers<[1], [0], [0], [1], [0, 0, 1, 1], [], []>} : vector<8x16xf32>, vector<16x16xf32>, vector<8x16xf32> -> vector<8x16xf32>
    %46 = arith.addf %44, %45 : vector<8x16xf32>
    %47 = vector.broadcast %37 : vector<1x16xf32> to vector<8x16xf32>
    %48 = arith.addf %46, %47 : vector<8x16xf32>
    %49 = math.sin %48 : vector<8x16xf32>
    %50 = math.cos %48 : vector<8x16xf32>
    %cst_32 = arith.constant dense<0.000000e+00> : vector<8x32xf32>
    %51 = tpu.matmul %49, %39, %cst_32 {dimension_numbers = #tpu.dot_dimension_numbers<[1], [0], [0], [1], [0, 0, 1, 1], [], []>} : vector<8x16xf32>, vector<16x32xf32>, vector<8x32xf32> -> vector<8x32xf32>
    %cst_33 = arith.constant dense<0.000000e+00> : vector<8x32xf32>
    %52 = tpu.matmul %50, %41, %cst_33 {dimension_numbers = #tpu.dot_dimension_numbers<[1], [0], [0], [1], [0, 0, 1, 1], [], []>} : vector<8x16xf32>, vector<16x32xf32>, vector<8x32xf32> -> vector<8x32xf32>
    %53 = arith.addf %51, %52 : vector<8x32xf32>
    %54 = vector.broadcast %43 : vector<1x32xf32> to vector<8x32xf32>
    %55 = arith.addf %53, %54 : vector<8x32xf32>
    %56 = arith.addf %31, %55 : vector<8x32xf32>
    %c1 = arith.constant 1 : index
    %c0_34 = arith.constant 0 : index
    %c0_35 = arith.constant 0 : index
    %57 = vector.load %arg7[%c1, %c0_34, %c0_35] : memref<2x16x16xf32, #tpu.memory_space<vmem>>, vector<1x16x16xf32>
    %58 = vector.shape_cast %57 : vector<1x16x16xf32> to vector<16x16xf32>
    %c1_36 = arith.constant 1 : index
    %c0_37 = arith.constant 0 : index
    %c0_38 = arith.constant 0 : index
    %59 = vector.load %arg8[%c1_36, %c0_37, %c0_38] : memref<2x16x16xf32, #tpu.memory_space<vmem>>, vector<1x16x16xf32>
    %60 = vector.shape_cast %59 : vector<1x16x16xf32> to vector<16x16xf32>
    %c1_39 = arith.constant 1 : index
    %c0_40 = arith.constant 0 : index
    %c0_41 = arith.constant 0 : index
    %61 = vector.load %arg9[%c1_39, %c0_40, %c0_41] : memref<2x1x16xf32, #tpu.memory_space<vmem>>, vector<1x1x16xf32>
    %62 = vector.shape_cast %61 : vector<1x1x16xf32> to vector<1x16xf32>
    %c1_42 = arith.constant 1 : index
    %c0_43 = arith.constant 0 : index
    %c0_44 = arith.constant 0 : index
    %63 = vector.load %arg10[%c1_42, %c0_43, %c0_44] : memref<2x16x32xf32, #tpu.memory_space<vmem>>, vector<1x16x32xf32>
    %64 = vector.shape_cast %63 : vector<1x16x32xf32> to vector<16x32xf32>
    %c1_45 = arith.constant 1 : index
    %c0_46 = arith.constant 0 : index
    %c0_47 = arith.constant 0 : index
    %65 = vector.load %arg11[%c1_45, %c0_46, %c0_47] : memref<2x16x32xf32, #tpu.memory_space<vmem>>, vector<1x16x32xf32>
    %66 = vector.shape_cast %65 : vector<1x16x32xf32> to vector<16x32xf32>
    %c1_48 = arith.constant 1 : index
    %c0_49 = arith.constant 0 : index
    %c0_50 = arith.constant 0 : index
    %67 = vector.load %arg12[%c1_48, %c0_49, %c0_50] : memref<2x1x32xf32, #tpu.memory_space<vmem>>, vector<1x1x32xf32>
    %68 = vector.shape_cast %67 : vector<1x1x32xf32> to vector<1x32xf32>
    %cst_51 = arith.constant dense<0.000000e+00> : vector<8x16xf32>
    %69 = tpu.matmul %49, %58, %cst_51 {dimension_numbers = #tpu.dot_dimension_numbers<[1], [0], [0], [1], [0, 0, 1, 1], [], []>} : vector<8x16xf32>, vector<16x16xf32>, vector<8x16xf32> -> vector<8x16xf32>
    %cst_52 = arith.constant dense<0.000000e+00> : vector<8x16xf32>
    %70 = tpu.matmul %50, %60, %cst_52 {dimension_numbers = #tpu.dot_dimension_numbers<[1], [0], [0], [1], [0, 0, 1, 1], [], []>} : vector<8x16xf32>, vector<16x16xf32>, vector<8x16xf32> -> vector<8x16xf32>
    %71 = arith.addf %69, %70 : vector<8x16xf32>
    %72 = vector.broadcast %62 : vector<1x16xf32> to vector<8x16xf32>
    %73 = arith.addf %71, %72 : vector<8x16xf32>
    %74 = math.sin %73 : vector<8x16xf32>
    %75 = math.cos %73 : vector<8x16xf32>
    %cst_53 = arith.constant dense<0.000000e+00> : vector<8x32xf32>
    %76 = tpu.matmul %74, %64, %cst_53 {dimension_numbers = #tpu.dot_dimension_numbers<[1], [0], [0], [1], [0, 0, 1, 1], [], []>} : vector<8x16xf32>, vector<16x32xf32>, vector<8x32xf32> -> vector<8x32xf32>
    %cst_54 = arith.constant dense<0.000000e+00> : vector<8x32xf32>
    %77 = tpu.matmul %75, %66, %cst_54 {dimension_numbers = #tpu.dot_dimension_numbers<[1], [0], [0], [1], [0, 0, 1, 1], [], []>} : vector<8x16xf32>, vector<16x32xf32>, vector<8x32xf32> -> vector<8x32xf32>
    %78 = arith.addf %76, %77 : vector<8x32xf32>
    %79 = vector.broadcast %68 : vector<1x32xf32> to vector<8x32xf32>
    %80 = arith.addf %78, %79 : vector<8x32xf32>
    %81 = arith.addf %56, %80 : vector<8x32xf32>
    %c0_55 = arith.constant 0 : index
    %c0_56 = arith.constant 0 : index
    %82 = vector.load %arg13[%c0_55, %c0_56] : memref<32x128xf32, #tpu.memory_space<vmem>>, vector<32x128xf32>
    %cst_57 = arith.constant dense<0.000000e+00> : vector<8x128xf32>
    %83 = tpu.matmul %81, %82, %cst_57 {dimension_numbers = #tpu.dot_dimension_numbers<[1], [0], [0], [1], [0, 0, 1, 1], [], []>} : vector<8x32xf32>, vector<32x128xf32>, vector<8x128xf32> -> vector<8x128xf32>
    %c0_58 = arith.constant 0 : index
    %c0_59 = arith.constant 0 : index
    %84 = vector.load %arg14[%c0_58, %c0_59] : memref<8x128xf32, #tpu.memory_space<vmem>>, vector<8x128xf32>
    tpu.vector_store %arg14[%c0_58, %c0_59], %83 {strides = array<i32>} : memref<8x128xf32, #tpu.memory_space<vmem>>, vector<8x128xf32>,
    return
  }
  func.func @transform_0(%arg0: i32) -> (i32, i32) {
    %c0_i32 = arith.constant 0 : i32
    %c0_i32_0 = arith.constant 0 : i32
    return %arg0, %c0_i32 : i32, i32
  }
  func.func @transform_1(%arg0: i32) -> (i32, i32) {
    %c0_i32 = arith.constant 0 : i32
    %c0_i32_0 = arith.constant 0 : i32
    %c0_i32_1 = arith.constant 0 : i32
    return %c0_i32, %c0_i32_0 : i32, i32
  }
  func.func @transform_2(%arg0: i32) -> (i32, i32) {
    %c0_i32 = arith.constant 0 : i32
    %c0_i32_0 = arith.constant 0 : i32
    %c0_i32_1 = arith.constant 0 : i32
    return %c0_i32, %c0_i32_0 : i32, i32
  }
  func.func @transform_3(%arg0: i32) -> (i32, i32) {
    %c0_i32 = arith.constant 0 : i32
    %c0_i32_0 = arith.constant 0 : i32
    %c0_i32_1 = arith.constant 0 : i32
    return %c0_i32, %c0_i32_0 : i32, i32
  }
  func.func @transform_4(%arg0: i32) -> (i32, i32) {
    %c0_i32 = arith.constant 0 : i32
    %c0_i32_0 = arith.constant 0 : i32
    %c0_i32_1 = arith.constant 0 : i32
    return %c0_i32, %c0_i32_0 : i32, i32
  }
  func.func @transform_5(%arg0: i32) -> (i32, i32) {
    %c0_i32 = arith.constant 0 : i32
    %c0_i32_0 = arith.constant 0 : i32
    %c0_i32_1 = arith.constant 0 : i32
    return %c0_i32, %c0_i32_0 : i32, i32
  }
  func.func @transform_6(%arg0: i32) -> (i32, i32, i32) {
    %c0_i32 = arith.constant 0 : i32
    %c0_i32_0 = arith.constant 0 : i32
    %c0_i32_1 = arith.constant 0 : i32
    %c0_i32_2 = arith.constant 0 : i32
    return %c0_i32, %c0_i32_0, %c0_i32_1 : i32, i32, i32
  }
  func.func @transform_7(%arg0: i32) -> (i32, i32, i32) {
    %c0_i32 = arith.constant 0 : i32
    %c0_i32_0 = arith.constant 0 : i32
    %c0_i32_1 = arith.constant 0 : i32
    %c0_i32_2 = arith.constant 0 : i32
    return %c0_i32, %c0_i32_0, %c0_i32_1 : i32, i32, i32
  }
  func.func @transform_8(%arg0: i32) -> (i32, i32, i32) {
    %c0_i32 = arith.constant 0 : i32
    %c0_i32_0 = arith.constant 0 : i32
    %c0_i32_1 = arith.constant 0 : i32
    %c0_i32_2 = arith.constant 0 : i32
    return %c0_i32, %c0_i32_0, %c0_i32_1 : i32, i32, i32
  }
  func.func @transform_9(%arg0: i32) -> (i32, i32, i32) {
    %c0_i32 = arith.constant 0 : i32
    %c0_i32_0 = arith.constant 0 : i32
    %c0_i32_1 = arith.constant 0 : i32
    %c0_i32_2 = arith.constant 0 : i32
    return %c0_i32, %c0_i32_0, %c0_i32_1 : i32, i32, i32
  }
  func.func @transform_10(%arg0: i32) -> (i32, i32, i32) {
    %c0_i32 = arith.constant 0 : i32
    %c0_i32_0 = arith.constant 0 : i32
    %c0_i32_1 = arith.constant 0 : i32
    %c0_i32_2 = arith.constant 0 : i32
    return %c0_i32, %c0_i32_0, %c0_i32_1 : i32, i32, i32
  }
  func.func @transform_11(%arg0: i32) -> (i32, i32, i32) {
    %c0_i32 = arith.constant 0 : i32
    %c0_i32_0 = arith.constant 0 : i32
    %c0_i32_1 = arith.constant 0 : i32
    %c0_i32_2 = arith.constant 0 : i32
    return %c0_i32, %c0_i32_0, %c0_i32_1 : i32, i32, i32
  }
  func.func @transform_12(%arg0: i32) -> (i32, i32) {
    %c0_i32 = arith.constant 0 : i32
    %c0_i32_0 = arith.constant 0 : i32
    %c0_i32_1 = arith.constant 0 : i32
    return %c0_i32, %c0_i32_0 : i32, i32
  }
  func.func @transform_13(%arg0: i32) -> (i32, i32) {
    %c0_i32 = arith.constant 0 : i32
    %c0_i32_0 = arith.constant 0 : i32
    return %arg0, %c0_i32 : i32, i32
  }
}

</mosaic_0001>

<bundles_post_ra>
// kernel: tpu_custom_call.1
= control target key start
LH: loop header
LB: loop body
LE: loop exit
PB: predicated region body
PF: predicated region fallthrough
CT: control target
= control target key end

     0   :  { %s3428_s0 = inlined_call_operand.vmem [shape: f32[16,3], index: 0, kind: input, shape index: {}]   ;;  %s3429_s1 = inlined_call_operand.hbm [shape: f32[3,16], index: 1, kind: input, shape index: {}]   ;;  %s3430_s2 = inlined_call_operand.hbm [shape: f32[1,16], index: 2, kind: input, shape index: {}]   ;;  %s3431_s3 = inlined_call_operand.hbm [shape: f32[16,32], index: 3, kind: input, shape index: {}]   ;;  %s3432_s4 = inlined_call_operand.hbm [shape: f32[16,32], index: 4, kind: input, shape index: {}]   ;;  %s3433_s5 = inlined_call_operand.hbm [shape: f32[1,32], index: 5, kind: input, shape index: {}]   ;;  %s3434_s6 = inlined_call_operand.hbm [shape: f32[2,16,16], index: 6, kind: input, shape index: {}]   ;;  %s3435_s7 = inlined_call_operand.vmem [shape: f32[2,16,16], index: 7, kind: input, shape index: {}]   ;;  %s3436_s8 = inlined_call_operand.vmem [shape: f32[2,1,16], index: 8, kind: input, shape index: {}]   ;;  %s3437_s9 = inlined_call_operand.hbm [shape: f32[2,16,32], index: 9, kind: input, shape index: {}]   ;;  %s3438_s10 = inlined_call_operand.hbm [shape: f32[2,16,32], index: 10, kind: input, shape index: {}]   ;;  %s3439_s11 = inlined_call_operand.vmem [shape: f32[2,1,32], index: 11, kind: input, shape index: {}]   ;;  %s3440_s12 = inlined_call_operand.hbm [shape: f32[32,128], index: 12, kind: input, shape index: {}]   ;;  %s3441_s13 = inlined_call_operand.hbm [shape: f32[16,128], index: 13, kind: output, shape index: {}]  }
   0x1   :  { %3449 = sst [smem:[#allocation28_spill]] %s3430_s2 }
   0x2   :  { %3450 = sst [smem:[#allocation29_spill]] %s3432_s4 }
   0x3   :  { %18 = vsyncpa [#allocation3], 0 }
   0x4   :  { %19 = vsyncpa [#allocation6], 0 }
   0x5   :  { %20 = vsyncpa [#allocation9], 0 }
   0x6   :  { %21 = vsyncpa [#allocation12], 0 }
   0x7   :  { %22 = vsyncpa [#allocation15], 0 }
   0x8   :  { %23 = vsyncpa [#allocation4], 0 }
   0x9   :  { %25 = vsyncpa [#allocation4 + $0x1], 0  ;;  %s3018_s25 = smov 0   ;;  %s3020_s26 = smov 0  }
   0xa   :  { %s3022_s27 = smov 0   ;;  %s3024_s28 = smov 0  }
   0xb LB: > { %3451 = sst [smem:[#allocation24_spill]] %s2919_s27  ;;  %s3039_s29 = sadd.s32 4294967295, %s2923_s28   ;;  %s2923_s28 = sphi %s3024_s28, %s3474_s28   ;;  %s2919_s27 = sphi %s3022_s27, %s3476_s27   ;;  %s2915_s26 = sphi %s3020_s26, %s3478_s26   ;;  %s2911_s25 = sphi %s3018_s25, %s3477_s25  }
   0xc   : > { %s2249_s30 = sadd.s32 4294967294, %s2923_s28   ;;  %s3043_s14 = sadd.s32 1, %s2923_s28  }
   0xd   : > { %3452 = sst [smem:[#allocation25_spill]] %s3043_s14  ;;  %s316_s15 = sadd.s32 1, %s2919_s27 }
   0xe   : > { %s313_s16 = ssub.s32 %s2923_s28, %s3043_s14  ;;  %p326_p0 = scmp.ne.s32.totalorder %s2919_s27, %s2915_s26 }
   0xf   : > { %p314_p1 = scmp.eq.s32.totalorder %s313_s16, 0  ;;  %p327_p2 = scmp.eq.s32.totalorder %s3039_s29, 1 }
  0x10   : > { %p332_p3 = scmp.ne.s32.totalorder %s2915_s26, %s2911_s25  ;;  %p333_p4 = scmp.eq.s32.totalorder %s2249_s30, 1 }
  0x11   : > { %s3054_s17 = scalar_select %p314_p1, %s2919_s27, %s316_s15  }
  0x12   : > { %p3056_p5 = por %p327_p2, %p326_p0  ;;  %p3060_p6 = por %p333_p4, %p332_p3 }
  0x13   : > { %3453 = sst [smem:[#allocation26_spill]] %s3054_s17  ;;  %p2250_p7 = scmp.ge.s32.totalorder %s2923_s28, 1 }
  0x14   : > { %s3455_s19 = scalar_select %p3060_p6, 1, 0 }
  0x15   : > { %p340_p8 = scmp.lt.s32.totalorder %s2923_s28, 3  ;;  %p3445_p9 = scmp.eq.s32.totalorder %s3039_s29, 0 }
  0x16   : > { %3456 = sst [smem:[#allocation27_spill]] %s3455_s19  ;;  %s2925_s21 = smov [#allocation5]  }
  0x17   : > { %p3067_p10 = pnand %p2250_p7, %p340_p8  ;;  %s364_s22 = sshll.u32 %s2925_s21, 4  ;;  %s365_s22 = int_to_ptr.vmem [resolvable:$true] %s364_s22 }
  0x18   : > { %s2926_s24 = smov [#allocation8]   ;;  %s2927_s15 = smov [#allocation11]  }
  0x19   : > { %p2488_p11 = pneg %p3067_p10  ;;  %s387_s30 = sshll.u32 %s2926_s24, 4  ;;  %s3079_s30 = int_to_ptr.vmem [resolvable:$true] %s387_s30 }
  0x1a   : > { %s411_s16 = sshll.u32 %s2927_s15, 4  ;;  %s2620_s21 = scalar_lea.vmem %s365_s22, 16  ;;  %s412_s16 = int_to_ptr.vmem [resolvable:$true] %s411_s16 }
  0x1b   : > { %p3075_p12 = pnand %p3445_p9, %p2488_p11  ;;  %p2621_p0 = scmp.ne.s32.totalorder %s365_s22, %s2620_s21 }
  0x1c   : > { %s2627_s27 = scalar_lea.vmem %s365_s22, 32  ;;  %p2628_p3 = scmp.lt.s32.totalorder %s365_s22, %s365_s22 }
  0x1d   : > { %p3083_p13 = pneg %p3075_p12  ;;  %p2629_p4 = scmp.lt.s32.totalorder %s2627_s27, %s2620_s21 }
  0x1f   : > { %p2623_p1 = pnand %p2621_p0, %p3083_p13  ;;  %p2630_p7 = por %p2629_p4, %p2628_p3 }
  0x21   : > { %p2624_p2 = pneg %p2623_p1 }
  0x23   : > { %p2631_p8 = pnand %p2630_p7, %p2624_p2 }
  0x25   : > { %2634 = shalt.err (!%p2631_p8)
}
  0x26   : > { %s3460_s2 = sld [smem:[#allocation28_spill]]  ;;  %s2646_s14 = scalar_lea.vmem %s3079_s30, 256 }
  0x27   : > { %p2647_p11 = scmp.ne.s32.totalorder %s3079_s30, %s2646_s14  ;;  %p2654_p9 = scmp.lt.s32.totalorder %s3079_s30, %s3079_s30 }
  0x28   : > { %p2655_p3 = scmp.lt.s32.totalorder %s2646_s14, %s2646_s14 }
  0x29   : > { %p2649_p0 = pnand %p2647_p11, %p3083_p13 }
  0x2a   : > { %p2656_p2 = por %p2655_p3, %p2654_p9 }
  0x2b   : > { %p2650_p1 = pneg %p2649_p0 }
  0x2c   : > { %2494 = dma.hbm_to_vmem [thread:$0]  (!%p3075_p12), %s3460_s2, 16, %s365_s22, [#allocation6]  }
  0x2d   : > { %p2657_p4 = pnand %p2656_p2, %p2650_p1 }
  0x2f   : > { %2660 = shalt.err (!%p2657_p4)
}
  0x30   : > { %s3447_s27 = smov 128   ;;  %s2929_s21 = smov 8  }
  0x31   : > { %s3461_s4 = sld [smem:[#allocation29_spill]]  ;;  %s2672_s15 = scalar_lea.vmem %s412_s16, 512 }
  0x32   : > { %p2673_p7 = scmp.ne.s32.totalorder %s412_s16, %s2672_s15  ;;  %p2680_p11 = scmp.lt.s32.totalorder %s412_s16, %s412_s16 }
  0x33   : > { %p2681_p0 = scmp.lt.s32.totalorder %s2672_s15, %s2672_s15 }
  0x34   : > { %p2675_p9 = pnand %p2673_p7, %p3083_p13 }
  0x35   : > { %p2682_p1 = por %p2681_p0, %p2680_p11 }
  0x36   : > { %p2676_p8 = pneg %p2675_p9 }
  0x37   : > { %2500 = dma.hbm_to_vmem [thread:$0]  (!%p3075_p12), %s3461_s4, 256, %s3079_s30, [#allocation9], %s3447_s27, %s3447_s27, %s2929_s21  }
  0x38   : > { %p2683_p3 = pnand %p2682_p1, %p2676_p8 }
  0x3a   : > { %2686 = shalt.err (!%p2683_p3)
}
  0x3b   : > { %2506 = dma.hbm_to_vmem [thread:$0]  (!%p3075_p12), %s3434_s6, 512, %s412_s16, [#allocation12], %s3447_s27, %s3447_s27, %s2929_s21  }
  0x3c   : > { %s2930_s30 = smov [#allocation14]   ;;  %s2931_s24 = smov [#allocation2]  }
  0x3d   : > { %s443_s22 = sshll.u32 %s2930_s30, 4  ;;  %s353_s4 = sshll.u32 %s2931_s24, 4  ;;  %s444_s22 = int_to_ptr.vmem [resolvable:$true] %s443_s22  ;;  %s354_s4 = int_to_ptr.vmem [resolvable:$true] %s353_s4 }
  0x3e   : > { %s2698_s19 = scalar_lea.vmem %s444_s22, 512  ;;  %p2706_p9 = scmp.lt.s32.totalorder %s444_s22, %s444_s22 }
  0x3f   : > { %p2699_p2 = scmp.ne.s32.totalorder %s444_s22, %s2698_s19  ;;  %p2707_p8 = scmp.lt.s32.totalorder %s2698_s19, %s2698_s19 }
  0x41   : > { %p2701_p4 = pnand %p2699_p2, %p3083_p13  ;;  %p2708_p11 = por %p2707_p8, %p2706_p9 }
  0x43   : > { %p2702_p7 = pneg %p2701_p4 }
  0x45   : > { %p2709_p0 = pnand %p2708_p11, %p2702_p7 }
  0x47   : > { %2712 = shalt.err (!%p2709_p0)
}
  0x48   : > { %2512 = dma.hbm_to_vmem [thread:$0]  (!%p3075_p12), %s3438_s10, 512, %s444_s22, [#allocation15], %s3447_s27, %s3447_s27, %s2929_s21  }
  0x49   : > { %s2724_s15 = scalar_lea.vmem %s354_s4, 64  ;;  %p2732_p4 = scmp.lt.s32.totalorder %s354_s4, %s354_s4 }
  0x4a   : > { %p2725_p1 = scmp.ne.s32.totalorder %s354_s4, %s2724_s15  ;;  %p2733_p9 = scmp.lt.s32.totalorder %s2724_s15, %s2724_s15 }
  0x4c   : > { %p2727_p3 = pnand %p2725_p1, %p3083_p13  ;;  %p2734_p7 = por %p2733_p9, %p2732_p4 }
  0x4e   : > { %p2728_p2 = pneg %p2727_p3 }
  0x50   : > { %p2735_p8 = pnand %p2734_p7, %p2728_p2 }
  0x52   : > { %2738 = shalt.err (!%p2735_p8)
}
  0x53   : > { %2491 = dma.hbm_to_vmem [thread:$0]  (!%p3075_p12), %s3429_s1, 64, %s354_s4, [#allocation3]  }
  0x54   : > { %s2932_s30 = smov [#allocation7]   ;;  %s2933_s24 = smov [#allocation10]  }
  0x55   : > { %s374_s22 = sshll.u32 %s2932_s30, 4  ;;  %s401_s2 = sshll.u32 %s2933_s24, 4  ;;  %s375_s22 = int_to_ptr.vmem [resolvable:$true] %s374_s22  ;;  %s402_s2 = int_to_ptr.vmem [resolvable:$true] %s401_s2 }
  0x56   : > { %s2750_s16 = scalar_lea.vmem %s375_s22, 256  ;;  %p2758_p3 = scmp.lt.s32.totalorder %s375_s22, %s375_s22 }
  0x57   : > { %p2751_p11 = scmp.ne.s32.totalorder %s375_s22, %s2750_s16  ;;  %p2759_p2 = scmp.lt.s32.totalorder %s2750_s16, %s2750_s16 }
  0x59   : > { %p2753_p0 = pnand %p2751_p11, %p3083_p13  ;;  %p2760_p4 = por %p2759_p2, %p2758_p3 }
  0x5b   : > { %p2754_p1 = pneg %p2753_p0 }
  0x5d   : > { %p2761_p9 = pnand %p2760_p4, %p2754_p1 }
  0x5f   : > { %2764 = shalt.err (!%p2761_p9)
}
  0x60   : > { %2497 = dma.hbm_to_vmem [thread:$0]  (!%p3075_p12), %s3431_s3, 256, %s375_s22, [#allocation6], %s3447_s27, %s3447_s27, %s2929_s21  }
  0x61   : > { %s2776_s19 = scalar_lea.vmem %s402_s2, 16  ;;  %s2783_s14 = scalar_lea.vmem %s402_s2, 32 }
  0x62   : > { %p2777_p7 = scmp.ne.s32.totalorder %s402_s2, %s2776_s19  ;;  %p2784_p0 = scmp.lt.s32.totalorder %s402_s2, %s402_s2 }
  0x63   : > { %p2785_p1 = scmp.lt.s32.totalorder %s2783_s14, %s2776_s19 }
  0x64   : > { %p2779_p8 = pnand %p2777_p7, %p3083_p13 }
  0x65   : > { %p2786_p3 = por %p2785_p1, %p2784_p0 }
  0x66   : > { %p2780_p11 = pneg %p2779_p8 }
  0x68   : > { %p2787_p2 = pnand %p2786_p3, %p2780_p11 }
  0x6a   : > { %2790 = shalt.err (!%p2787_p2)
}
  0x6b   : > { %2503 = dma.hbm_to_vmem [thread:$0]  (!%p3075_p12), %s3433_s5, 16, %s402_s2, [#allocation9]  }
  0x6c   : > { %s2934_s22 = smov [#allocation13]   ;;  %s2935_s4 = smov [#allocation16]  }
  0x6d   : > { %s430_s16 = sshll.u32 %s2934_s22, 4  ;;  %s459_s15 = sshll.u32 %s2935_s4, 4  ;;  %s431_s16 = int_to_ptr.vmem [resolvable:$true] %s430_s16  ;;  %s460_s15 = int_to_ptr.vmem [resolvable:$true] %s459_s15 }
  0x6e   : > { %s2802_s27 = scalar_lea.vmem %s431_s16, 512  ;;  %p2810_p8 = scmp.lt.s32.totalorder %s431_s16, %s431_s16 }
  0x6f   : > { %p2803_p4 = scmp.ne.s32.totalorder %s431_s16, %s2802_s27  ;;  %p2811_p11 = scmp.lt.s32.totalorder %s2802_s27, %s2802_s27 }
  0x71   : > { %p2805_p9 = pnand %p2803_p4, %p3083_p13  ;;  %p2812_p0 = por %p2811_p11, %p2810_p8 }
  0x73   : > { %p2806_p7 = pneg %p2805_p9 }
  0x75   : > { %p2813_p1 = pnand %p2812_p0, %p2806_p7 }
  0x77   : > { %2816 = shalt.err (!%p2813_p1)
}
  0x78   : > { %s3462_s19 = smov 128   ;;  %s2828_s30 = scalar_lea.vmem %s460_s15, 512 }
  0x79   : > { %2509 = dma.hbm_to_vmem [thread:$0]  (!%p3075_p12), %s3437_s9, 512, %s431_s16, [#allocation12], %s3462_s19, %s3462_s19, %s2929_s21  }
  0x7a   : > { %p2829_p3 = scmp.ne.s32.totalorder %s460_s15, %s2828_s30  ;;  %p2836_p9 = scmp.lt.s32.totalorder %s460_s15, %s460_s15 }
  0x7b   : > { %p2837_p8 = scmp.lt.s32.totalorder %s2828_s30, %s2828_s30 }
  0x7c   : > { %p2831_p2 = pnand %p2829_p3, %p3083_p13 }
  0x7d   : > { %p2838_p7 = por %p2837_p8, %p2836_p9 }
  0x7e   : > { %p2832_p4 = pneg %p2831_p2 }
  0x80   : > { %p2839_p11 = pnand %p2838_p7, %p2832_p4 }
  0x82   : > { %2842 = shalt.err (!%p2839_p11)
}
  0x83   : > { %2515 = dma.hbm_to_vmem [thread:$0]  (!%p3075_p12), %s3440_s12, 512, %s460_s15, [#allocation15], %s3462_s19, %s3462_s19, %s2929_s21  }
  0x84   : > { %482 = sbr.rel (%p3067_p10) target bundleno = 1352 (0x548), region = 72  ;;  %p3463_p13 = scmp.eq.s32.totalorder (!%p3067_p10), %s3039_s29, 0 }
  0x89   : > { %2886 = dma.done.wait (%p3463_p13), [#allocation3], 64   ;;  %p3464_p0 = pmov %p3463_p13 }
  0x8b   : > { %2888 = vsyncadd (%p3464_p0), [#allocation3], 4294967232  ;;  %p3465_p1 = pmov %p3464_p0 }
  0x8c   : > { %p3466_p3 = pmov %p3464_p0 }
  0x8d   : > { %2890 = dma.done.wait (%p3465_p1), [#allocation6], 272  }
  0x8e   : > { %2892 = vsyncadd (%p3466_p3), [#allocation6], 4294967024  ;;  %p3467_p2 = pmov %p3464_p0 }
  0x8f   : > { %p3468_p12 = pmov %p3464_p0 }
  0x90   : > { %2894 = dma.done.wait (%p3467_p2), [#allocation9], 272  }
  0x91   : > { %2896 = vsyncadd (%p3468_p12), [#allocation9], 4294967024  ;;  %p3469_p10 = pmov %p3464_p0 }
  0x92   : > { %p3470_p4 = pmov %p3464_p0 }
  0x93   : > { %2898 = dma.done.wait (%p3469_p10), [#allocation12], 1024  }
  0x94   : > { %2900 = vsyncadd (%p3470_p4), [#allocation12], 4294966272  ;;  %p3471_p9 = pmov %p3464_p0 }
  0x95   : > { %p3472_p8 = pmov %p3464_p0 }
  0x96   : > { %2902 = dma.done.wait (%p3471_p9), [#allocation15], 1024  }
  0x97   : > { %2904 = vsyncadd (%p3472_p8), [#allocation15], 4294966272  ;;  %p557_p7 = scmp.lt.s32.totalorder %s3039_s29, 1  ;;  %v2936_v0 = vmov 0   ;;  %v2937_v1 = vmov 2   ;;  %v2938_v3 = vmov 1   ;;  %v569_v9 = vlaneseq }
  0x98   : > { %2593 = vset.pattern.permute.xlu0 %v2936_v0  ;;  %2595 = vset.pattern.permute.xlu1 %v2937_v1  ;;  %v811_v4 = vld [vmem:[#allocation8 + $0x8] sm:$0xff]  ;;  %v970_v5 = vld [vmem:[%s3435_s7 + $0x8] sm:$0xff]  ;;  %v2939_v6 = vmov 0.0   ;;  %v810_v7 = vld [vmem:[#allocation8] sm:$0xff]  ;;  %vm2940_vm0 = vmmov 0   ;;  %vm812_vm11 = vcmask 130048  }
  0x99   : > { %s558_s17 = scalar_select %p557_p7, %s3039_s29, 1  ;;  %2357 = vmatprep.subr.mxu1 %v2939_v6  ;;  %2371 = vmatprep.subr.mxu0 %v2939_v6  ;;  %v969_v8 = vld [vmem:[%s3435_s7] sm:$0xff]  ;;  %v570_v10 = vshrl.u32 %v569_v9, 7  ;;  %v2941_v38 = vmov 683565275  }
  0x9a   : > { %2358 = vmatpush3.msra.mxu1 %v811_v4  ;;  %2372 = vmatpush3.msra.mxu0 %v970_v5  ;;  %v562_v12 = vld [vmem:[#allocation2] sm:$0x7]  ;;  %v2273_v20 = vld [vmem:[#allocation5] ss:$0 sm:$0xff]  ;;  %v2942_v40 = vmov 2475754826  }
  0x9b   : > { %s2272_s20 = sshll.u32 %s558_s17, 3  ;;  %2359 = vmatprep.subr.mxu1 %v2939_v6  ;;  %2373 = vmatprep.subr.mxu0 %v2939_v6  ;;  %v571_v11 = vsub.s32 0, %v570_v10  ;;  %v587_v14 = vsub.s32 1, %v570_v10  ;;  %v597_v15 = vsub.s32 2, %v570_v10  ;;  %v2943_v43 = vmov 2131351028  }
  0x9c   : > { %s560_s22 = scalar_lea.vmem %s3428_s0, %s2272_s20  ;;  %2360 = vmatpush3.msra.mxu1 %v810_v7  ;;  %2361 = vmatprep.mubr.msk.f32.mxu1 %vm2940_vm0, %v2939_v6  ;;  %v2944_v46 = vmov 2102212464   ;;  %v2945_v49 = vmov 920167782   ;;  %v2946_v52 = vmov 1326507024  }
  0x9d   : > { %v561_v2 = vld [vmem:[%s560_s22] sm:$0xff]  ;;  %2364 = vmatprep.subr.mxu1 %v2939_v6  ;;  %2374 = vmatpush3.msra.mxu0 %v969_v8  ;;  %v572_v13 = vrot.slane %v562_v12, %v571_v11  ;;  %v588_v18 = vrot.slane %v562_v12, %v587_v14  ;;  %v598_v19 = vrot.slane %v562_v12, %v597_v15  ;;  %s554_s15 = sand.u32 1, %s2915_s26   ;;  %s2319_s30 = sshll.u32 %s3039_s29, 7 }
  0x9e   : > { %566 = vperm.xlu0 %2593, %v561_v2   ;;  %592 = vperm.xlu1 %2595, %v561_v2   ;;  %s2271_s19 = sshll.u32 %s554_s15, 3  ;;  %s3389_s17 = scalar_lea.hbm %s3441_s13, %s2319_s30 }
  0x9f   : > { %2375 = vmatprep.mubr.msk.f32.mxu0 %vm2940_vm0, %v2939_v6  ;;  %2385 = vmatprep.subr.mxu0 %v2939_v6  ;;  %s556_s2 = scalar_lea.vmem [#allocation17], %s2271_s19  ;;  %s2089_s20 = scalar_lea.sflag [#allocation4], %s554_s15 }
  0xa0   : > { %s2102_s14 = sshll.u32 %s556_s2, 4  ;;  %s2947_s29 = smov [#allocation17]   ;;  %s3384_s14 = int_to_ptr.vmem [resolvable:$true] %s2102_s14 }
  0xa1   : > { %s2843_s23 = scalar_lea.vmem %s3384_s14, 128  ;;  %s2847_s21 = sshll.u32 %s2947_s29, 4  ;;  %s2848_s21 = int_to_ptr.vmem [resolvable:$false] %s2847_s21 }
  0xa2   : > { %2594 = vset.pattern.permute.xlu0 %v2938_v3  ;;  %p2844_p11 = scmp.ne.s32.totalorder %s3384_s14, %s2843_s23  ;;  %s2849_s22 = scalar_lea.vmem %s2848_s21, 256 }
  0xa3   : > { %582 = vperm.xlu0 %2594, %v561_v2   ;;  %p2850_p1 = scmp.lt.s32.totalorder %s3384_s14, %s2848_s21  ;;  %p2851_p3 = scmp.lt.s32.totalorder %s2849_s22, %s2843_s23 }
  0xa4   : > { %p2845_p13 = pnand %p2844_p11, %p3056_p5 }
  0xa5   : > { %p2852_p2 = por %p2851_p3, %p2850_p1 }
  0xa6   : > { %p2846_p0 = pneg %p2845_p13 }
  0xa7   : > { %2596 = vset.pattern.permute.xlu0 %v2937_v1 }
  0xa8   : > { %p2853_p12 = pnand %p2852_p2, %p2846_p0 }
 0x119   : > { %v567_v16 = vpop.permute.xlu0 %566  ;;  %v593_v21 = vpop.permute.xlu1 %592 }
 0x11a   : > { %v573_v17 = vmul.f32 %v572_v13, %v567_v16  ;;  %v599_v25 = vmul.f32 %v598_v19, %v593_v21 }
 0x11c   : > { %v580_v23 = vadd.f32 %v2273_v20, %v573_v17 }
 0x11e   : > { %v583_v22 = vpop.permute.xlu0 %582 }
 0x11f   : > { %v589_v24 = vmul.f32 %v588_v18, %v583_v22 }
 0x121   : > { %v590_v26 = vadd.f32 %v589_v24, %v580_v23 }
 0x123   : > { %v3216_v27 = vadd.f32 %v599_v25, %v590_v26 }
 0x125   : > { %v604_v28 = vand.u32 2139095040, %v3216_v27  ;;  %v601_v32 = vand.u32 2147483647, %v3216_v27  ;;  %vm603_vm8 = vcmp.lt.s32.totalorder %v3216_v27, 0 }
 0x127   : > { %v605_v29 = vshrl.u32 %v604_v28, 23  ;;  %v608_v35 = vand.u32 8388607, %v601_v32  ;;  %vm602_vm9 = vcmp.le.f32.partialorder %v601_v32, 0.7853982 }
 0x129   : > { %v2274_v30 = vadd.s32 4294967169, %v605_v29  ;;  %v609_v54 = vor.u32 8388608, %v608_v35 }
 0x12b   : > { %v611_v31 = vadd.s32 1, %v2274_v30  ;;  %v649_v4 = vshll.u32 %v609_v54, 8 }
 0x12d   : > { %vm612_vm1 = vcmp.gt.s32.totalorder %v611_v31, 0 }
 0x12e   : > { %v613_v33 = vsel %vm612_vm1, %v611_v31, 0  ;;  %vm693_vm1 = vweird.f32 %v3216_v27 }
 0x12f   : > { %v615_v34 = vand.u32 31, %v613_v33  ;;  %v614_v37 = vshrl.u32 %v613_v33, 5 }
 0x131   : > { %v616_v36 = vsub.s32 32, %v615_v34  ;;  %v618_v39 = vshll.u32 %v2941_v38, %v615_v34  ;;  %v621_v41 = vshll.u32 %v2942_v40, %v615_v34  ;;  %v624_v45 = vshll.u32 %v2943_v43, %v615_v34 }
 0x132   : > { %v627_v48 = vshll.u32 %v2944_v46, %v615_v34  ;;  %v630_v51 = vshll.u32 %v2945_v49, %v615_v34  ;;  %vm633_vm2 = vcmp.lt.s32.totalorder %v614_v37, 1  ;;  %vm636_vm3 = vcmp.lt.s32.totalorder %v614_v37, 4 }
 0x133   : > { %v619_v42 = vshrl.u32 %v2942_v40, %v616_v36  ;;  %v622_v44 = vshrl.u32 %v2943_v43, %v616_v36  ;;  %v625_v47 = vshrl.u32 %v2944_v46, %v616_v36  ;;  %v628_v50 = vshrl.u32 %v2945_v49, %v616_v36 }
 0x134   : > { %v631_v53 = vshrl.u32 %v2946_v52, %v616_v36  ;;  %v617_v63 = vshrl.u32 %v2941_v38, %v616_v36  ;;  %vm635_vm4 = vcmp.lt.s32.totalorder %v614_v37, 3  ;;  %vm634_vm5 = vcmp.lt.s32.totalorder %v614_v37, 2 }
 0x135   : > { %v620_v55 = vor.u32 %v619_v42, %v618_v39  ;;  %v623_v56 = vor.u32 %v622_v44, %v621_v41  ;;  %v626_v57 = vor.u32 %v625_v47, %v624_v45  ;;  %v629_v58 = vor.u32 %v628_v50, %v627_v48 }
 0x136   : > { %v632_v59 = vor.u32 %v631_v53, %v630_v51 }
 0x137   : > { %v638_v60 = vsel %vm636_vm3, %v626_v57, 2102212464  ;;  %v641_v61 = vsel %vm633_vm2, %v620_v55, %v623_v56  ;;  %v645_v62 = vsel %vm633_vm2, %v623_v56, %v626_v57  ;;  %v642_v0 = vsel %vm636_vm3, %v629_v58, 920167782 }
 0x138   : > { %v646_v1 = vsel %vm636_vm3, %v632_v59, 1326507024  ;;  %v643_v2 = vsel %vm635_vm4, %v626_v57, %v642_v0  ;;  %v637_v5 = vsel %vm633_vm2, %v617_v63, %v620_v55  ;;  %v639_v7 = vsel %vm635_vm4, %v623_v56, %v638_v60 }
 0x139   : > { %v647_v3 = vsel %vm635_vm4, %v629_v58, %v646_v1  ;;  %v644_v8 = vsel %vm634_vm5, %v641_v61, %v643_v2  ;;  %v640_v14 = vsel %vm634_vm5, %v637_v5, %v639_v7  ;;  %v809_v1 = vld [vmem:[#allocation7 + $0x8] sm:$0xff] }
 0x13a   : > { %v648_v9 = vsel %vm634_vm5, %v645_v62, %v647_v3  ;;  %v3236_v12 = vmul.u32.u64.low %v649_v4, %v644_v8  ;;  %v3237_v13 = vmul.u32.u64.high %v649_v4, %v644_v8, %v3236_v12  ;;  %v656_v16 = vmul.u32 %v649_v4, %v640_v14  ;;  %v968_v5 = vld [vmem:[#allocation11 + $0x8] sm:$0xff]  ;;  %v967_v7 = vld [vmem:[#allocation11] sm:$0xff] }
 0x13b   : > { %v3233_v10 = vmul.u32.u64.low %v649_v4, %v648_v9  ;;  %v3234_v11 = vmul.u32.u64.high %v649_v4, %v648_v9, %v3233_v10  ;;  %v808_v4 = vld [vmem:[#allocation7] sm:$0xff]  ;;  %v975_v8 = vld [vmem:[#allocation14 + $0x8] sm:$0xff] }
 0x13c   : > { %v659_v15 = vadd.s32 1, %v3237_v13  ;;  %v973_v9 = vld [vmem:[#allocation13 + $0x8] sm:$0xff]  ;;  %v974_v10 = vld [vmem:[#allocation14] sm:$0xff] }
 0x13d   : > { %vm658_vm6 = vc.u32 %v3234_v11, %v3236_v12  ;;  %v657_v29 = vadd.s32 %v3236_v12, %v3234_v11  ;;  %v972_v11 = vld [vmem:[#allocation13] sm:$0xff] }
 0x13e   : > { %v660_v17 = vsel %vm658_vm6, %v659_v15, %v3237_v13 }
 0x13f   : > { %v661_v18 = vadd.s32 %v660_v17, %v656_v16 }
 0x141   : > { %v662_v19 = vadd.s32 536870912, %v661_v18 }
 0x143   : > { %v663_v20 = vshrl.u32 %v662_v19, 30  ;;  %v2287_v19 = vld [vmem:[%s3436_s8] ss:$0 sm:$0xff] }
 0x145   : > { %v664_v21 = vshll.u32 %v663_v20, 30  ;;  %v687_v48 = vsub.s32 4, %v663_v20 }
 0x147   : > { %v665_v22 = vsub.s32 %v661_v18, %v664_v21  ;;  %v688_v51 = vsel %vm603_vm8, %v687_v48, %v663_v20 }
 0x148   : > { %v690_v53 = vsel %vm602_vm9, 0, %v688_v51 }
 0x149   : > { %v667_v23 = vsub.s32 0, %v665_v22  ;;  %v694_v54 = vadd.s32 3, %v690_v53  ;;  %v798_v55 = vand.u32 3, %v690_v53 }
 0x14b   : > { %v2275_v24 = vmin.u32 %v667_v23, %v665_v22  ;;  %v695_v56 = vand.u32 3, %v694_v54  ;;  %vm803_vm10 = vcmp.eq.s32.totalorder %v798_v55, 2  ;;  %vm800_vm14 = vcmp.eq.s32.totalorder %v798_v55, 0 }
 0x14c   : > { %vm799_vm15 = vcmp.lt.s32.totalorder %v798_v55, 2 }
 0x14d   : > { %v669_v25 = vclz %v2275_v24  ;;  %vm697_vm12 = vcmp.eq.s32.totalorder %v695_v56, 0  ;;  %vm700_vm13 = vcmp.eq.s32.totalorder %v695_v56, 2  ;;  %vm696_vm2 = vcmp.lt.s32.totalorder %v695_v56, 2 }
 0x14f   : > { %v2276_v26 = vadd.s32 4294967294, %v669_v25 }
 0x151   : > { %vm2277_vm7 = vcmp.lt.s32.totalorder %v2276_v26, 0 }
 0x152   : > { %v672_v28 = vsel %vm2277_vm7, 0, %v2276_v26 }
 0x153   : > { %v673_v30 = vsub.s32 32, %v672_v28  ;;  %v677_v31 = vsub.s32 4294967266, %v672_v28  ;;  %v674_v33 = vshll.u32 %v665_v22, %v672_v28 }
 0x155   : > { %v675_v34 = vshrl.u32 %v657_v29, %v673_v30  ;;  %v678_v35 = vadd.s32 127, %v677_v31 }
 0x157   : > { %v676_v36 = vor.u32 %v675_v34, %v674_v33  ;;  %v679_v37 = vshll.u32 %v678_v35, 23 }
 0x159   : > { %v680_v39 = vor.u32 4788187, %v679_v37  ;;  %v683_v42 = vcvt.s32.f32 %v676_v36 }
 0x15b   : > { %v681_v41 = vand.u32 2147483647, %v680_v39 }
 0x15d   : > { %v684_v44 = vmul.f32 %v683_v42, %v681_v41 }
 0x15f   : > { %v685_v45 = vxor.u32 2147483648, %v684_v44 }
 0x161   : > { %v686_v47 = vsel %vm603_vm8, %v685_v45, %v684_v44 }
 0x162   : > { %v689_v50 = vsel %vm602_vm9, %v3216_v27, %v686_v47 }
 0x163   : > { %2597 = vcosq.f32 %v689_v50 }
 0x164   : > { %2599 = vsinq.f32 %v689_v50 }
 0x170   : > { %v2598_v57 = vpop.eup %2597 }
 0x171   : > { %v2600_v58 = vpop.eup %2599  ;;  %v701_v59 = vxor.u32 2147483648, %v2598_v57 }
 0x172   : > { %v698_v60 = vxor.u32 2147483648, %v2600_v58 }
 0x173   : > { %v805_v32 = vsel %vm803_vm10, %v701_v59, %v2600_v58  ;;  %v702_v62 = vsel %vm700_vm13, %v701_v59, %v2600_v58 }
 0x174   : > { %v699_v61 = vsel %vm697_vm12, %v2598_v57, %v698_v60  ;;  %v802_v63 = vsel %vm800_vm14, %v2598_v57, %v698_v60 }
 0x175   : > { %v806_v0 = vsel %vm799_vm15, %v802_v63, %v805_v32  ;;  %v703_v3 = vsel %vm696_vm2, %v699_v61, %v702_v62 }
 0x176   : > { %v807_v2 = vsel %vm693_vm1, nan, %v806_v0  ;;  %v704_v27 = vsel %vm693_vm1, nan, %v703_v3 }
 0x177   : > { %2362 = vmatmul.mubr.msk.f32.vlgmr.msra.gmra.mxu1 %vm812_vm11, %v807_v2  ;;  %2376 = vmatmul.mubr.msk.f32.vlgmr.msra.gmra.mxu0 %vm812_vm11, %v807_v2 }
 0x178   : > { %2365 = vmatpush3.msra.mxu1 %v809_v1  ;;  %2368 = vmatprep.mubr.msk.f32.mxu1 %vm2940_vm0, %v2939_v6 }
 0x179   : > { %2366 = vmatprep.subr.mxu1 %v2939_v6  ;;  %2389 = vmatprep.mubr.msk.f32.mxu0 %vm2940_vm0, %v2939_v6 }
 0x17a   : > { %2367 = vmatpush3.msra.mxu1 %v808_v4  ;;  %2386 = vmatpush3.msra.mxu0 %v975_v8 }
 0x17b   : > { %2378 = vmatprep.subr.mxu1 %v2939_v6  ;;  %2369 = vmatmul.mubr.msk.f32.vlgmr.msra.gmra.mxu1 %vm812_vm11, %v704_v27 }
 0x17c   : > { %2379 = vmatpush3.msra.mxu1 %v968_v5  ;;  %2382 = vmatprep.mubr.msk.f32.mxu1 %vm2940_vm0, %v2939_v6 }
 0x17d   : > { %2380 = vmatprep.subr.mxu1 %v2939_v6  ;;  %2387 = vmatprep.subr.mxu0 %v2939_v6 }
 0x17e   : > { %2381 = vmatpush3.msra.mxu1 %v967_v7  ;;  %2388 = vmatpush3.msra.mxu0 %v974_v10 }
 0x17f   : > { %2383 = vmatmul.mubr.msk.f32.vlgmr.msra.gmra.mxu1 %vm812_vm11, %v704_v27  ;;  %2392 = vmatprep.subr.mxu1 %v2939_v6 }
 0x180   : > { %2396 = vmatprep.mubr.msk.f32.mxu1 %vm2940_vm0, %v2939_v6  ;;  %2393 = vmatpush3.msra.mxu1 %v973_v9 }
 0x181   : > { %2394 = vmatprep.subr.mxu1 %v2939_v6  ;;  %2399 = vmatprep.subr.mxu0 %v2939_v6 }
 0x182   : > { %2395 = vmatpush3.msra.mxu1 %v972_v11 }
 0x183   : > { %2406 = vmatprep.subr.mxu1 %v2939_v6 }
 0x237   : > { %v882_v12 = vpop.f32.mrf.mxu1  ;;  %v1043_v13 = vpop.f32.mrf.mxu0 }
 0x239   : > { %v2363_v14 = vpop.f32.mrf.mxu1  ;;  %v2377_v15 = vpop.f32.mrf.mxu0 }
 0x23b   : > { %v955_v16 = vpop.f32.mrf.mxu1 }
 0x23c   : > { %v3268_v17 = vadd.f32 %v955_v16, %v882_v12 }
 0x23d   : > { %v2370_v18 = vpop.f32.mrf.mxu1 }
 0x23f   : > { %v1113_v20 = vpop.f32.mrf.mxu1 }
 0x240   : > { %v1114_v21 = vadd.f32 %v1113_v20, %v1043_v13 }
 0x241   : > { %v2384_v22 = vpop.f32.mrf.mxu1 }
 0x242   : > { %v3273_v23 = vadd.f32 %v2287_v19, %v1114_v21 }
 0x244   : > { %v1127_v24 = vand.u32 2139095040, %v3273_v23  ;;  %v1124_v29 = vand.u32 2147483647, %v3273_v23  ;;  %vm1126_vm10 = vcmp.lt.s32.totalorder %v3273_v23, 0 }
 0x246   : > { %v1128_v25 = vshrl.u32 %v1127_v24, 23  ;;  %v1131_v33 = vand.u32 8388607, %v1124_v29  ;;  %vm1125_vm12 = vcmp.le.f32.partialorder %v1124_v29, 0.7853982 }
 0x248   : > { %v2288_v26 = vadd.s32 4294967169, %v1128_v25  ;;  %v1132_v51 = vor.u32 8388608, %v1131_v33 }
 0x24a   : > { %v1134_v28 = vadd.s32 1, %v2288_v26  ;;  %v1172_v1 = vshll.u32 %v1132_v51, 8 }
 0x24c   : > { %vm1135_vm3 = vcmp.gt.s32.totalorder %v1134_v28, 0 }
 0x24d   : > { %v1136_v30 = vsel %vm1135_vm3, %v1134_v28, 0 }
 0x24e   : > { %v1138_v31 = vand.u32 31, %v1136_v30  ;;  %v1137_v35 = vshrl.u32 %v1136_v30, 5 }
 0x250   : > { %v1139_v34 = vsub.s32 32, %v1138_v31  ;;  %v1141_v36 = vshll.u32 %v2941_v38, %v1138_v31  ;;  %v1144_v37 = vshll.u32 %v2942_v40, %v1138_v31  ;;  %v1147_v42 = vshll.u32 %v2943_v43, %v1138_v31 }
 0x251   : > { %v1150_v45 = vshll.u32 %v2944_v46, %v1138_v31  ;;  %v1153_v48 = vshll.u32 %v2945_v49, %v1138_v31  ;;  %vm1156_vm4 = vcmp.lt.s32.totalorder %v1137_v35, 1  ;;  %vm1159_vm5 = vcmp.lt.s32.totalorder %v1137_v35, 4 }
 0x252   : > { %v1142_v39 = vshrl.u32 %v2942_v40, %v1139_v34  ;;  %v1145_v41 = vshrl.u32 %v2943_v43, %v1139_v34  ;;  %v1148_v44 = vshrl.u32 %v2944_v46, %v1139_v34  ;;  %v1151_v47 = vshrl.u32 %v2945_v49, %v1139_v34 }
 0x253   : > { %v1154_v50 = vshrl.u32 %v2946_v52, %v1139_v34  ;;  %v1140_v32 = vshrl.u32 %v2941_v38, %v1139_v34  ;;  %vm1158_vm6 = vcmp.lt.s32.totalorder %v1137_v35, 3  ;;  %vm1157_vm7 = vcmp.lt.s32.totalorder %v1137_v35, 2 }
 0x254   : > { %v1143_v53 = vor.u32 %v1142_v39, %v1141_v36  ;;  %v1146_v54 = vor.u32 %v1145_v41, %v1144_v37  ;;  %v1149_v55 = vor.u32 %v1148_v44, %v1147_v42  ;;  %v1152_v56 = vor.u32 %v1151_v47, %v1150_v45 }
 0x255   : > { %v1155_v57 = vor.u32 %v1154_v50, %v1153_v48 }
 0x256   : > { %v1161_v58 = vsel %vm1159_vm5, %v1149_v55, 2102212464  ;;  %v1164_v59 = vsel %vm1156_vm4, %v1143_v53, %v1146_v54  ;;  %v1168_v60 = vsel %vm1156_vm4, %v1146_v54, %v1149_v55  ;;  %v1165_v61 = vsel %vm1159_vm5, %v1152_v56, 920167782 }
 0x257   : > { %v1169_v62 = vsel %vm1159_vm5, %v1155_v57, 1326507024  ;;  %v1166_v63 = vsel %vm1158_vm6, %v1149_v55, %v1165_v61  ;;  %v1160_v2 = vsel %vm1156_vm4, %v1140_v32, %v1143_v53  ;;  %v1162_v3 = vsel %vm1158_vm6, %v1146_v54, %v1161_v58 }
 0x258   : > { %v1170_v0 = vsel %vm1158_vm6, %v1152_v56, %v1169_v62  ;;  %v1167_v4 = vsel %vm1157_vm7, %v1164_v59, %v1166_v63  ;;  %v1163_v10 = vsel %vm1157_vm7, %v1160_v2, %v1162_v3  ;;  %vm1216_vm4 = vweird.f32 %v3273_v23 }
 0x259   : > { %v1171_v5 = vsel %vm1157_vm7, %v1168_v60, %v1170_v0  ;;  %v3293_v8 = vmul.u32.u64.low %v1172_v1, %v1167_v4  ;;  %v3294_v9 = vmul.u32.u64.high %v1172_v1, %v1167_v4, %v3293_v8  ;;  %v1179_v12 = vmul.u32 %v1172_v1, %v1163_v10  ;;  %v2300_v0 = vld [vmem:[%s3435_s7 + $0x18] sm:$0xff]  ;;  %v2299_v4 = vld [vmem:[%s3435_s7 + $0x10] sm:$0xff] }
 0x25a   : > { %v3290_v27 = vmul.u32.u64.low %v1172_v1, %v1171_v5  ;;  %v3291_v7 = vmul.u32.u64.high %v1172_v1, %v1171_v5, %v3290_v27  ;;  %v1487_v1 = vld [vmem:[#allocation11 + $0x18] sm:$0xff]  ;;  %v1486_v5 = vld [vmem:[#allocation11 + $0x10] sm:$0xff] }
 0x25b   : > { %v1182_v11 = vadd.s32 1, %v3294_v9  ;;  %v1495_v27 = vld [vmem:[#allocation13 + $0x18] sm:$0xff] }
 0x25c   : > { %vm1181_vm8 = vc.u32 %v3291_v7, %v3293_v8  ;;  %v1180_v26 = vadd.s32 %v3293_v8, %v3291_v7  ;;  %v1497_v7 = vld [vmem:[#allocation14 + $0x10] sm:$0xff] }
 0x25d   : > { %v1183_v13 = vsel %vm1181_vm8, %v1182_v11, %v3294_v9  ;;  %v1494_v8 = vld [vmem:[#allocation13 + $0x10] sm:$0xff]  ;;  %v2284_v9 = vld [vmem:[#allocation10] ss:$0 sm:$0xff]  ;;  %v2298_v11 = vld [vmem:[%s3439_s11] ss:$0 sm:$0xff] }
 0x25e   : > { %v1184_v14 = vadd.s32 %v1183_v13, %v1179_v12 }
 0x260   : > { %v1185_v15 = vadd.s32 536870912, %v1184_v14 }
 0x262   : > { %v1186_v16 = vshrl.u32 %v1185_v15, 30 }
 0x264   : > { %v1187_v18 = vshll.u32 %v1186_v16, 30  ;;  %v1210_v45 = vsub.s32 4, %v1186_v16 }
 0x266   : > { %v1188_v19 = vsub.s32 %v1184_v14, %v1187_v18  ;;  %v1211_v50 = vsel %vm1126_vm10, %v1210_v45, %v1186_v16  ;;  %v966_v16 = vadd.f32 %v2284_v9, %v3268_v17 }
 0x267   : > { %v1213_v51 = vsel %vm1125_vm12, 0, %v1211_v50 }
 0x268   : > { %v1190_v20 = vsub.s32 0, %v1188_v19  ;;  %v1217_v53 = vadd.s32 3, %v1213_v51  ;;  %v1321_v54 = vand.u32 3, %v1213_v51 }
 0x26a   : > { %v2289_v21 = vmin.u32 %v1190_v20, %v1188_v19  ;;  %v1218_v55 = vand.u32 3, %v1217_v53  ;;  %vm1326_vm13 = vcmp.eq.s32.totalorder %v1321_v54, 2  ;;  %vm1323_vm15 = vcmp.eq.s32.totalorder %v1321_v54, 0 }
 0x26b   : > { %vm1322_vm2 = vcmp.lt.s32.totalorder %v1321_v54, 2 }
 0x26c   : > { %v1192_v22 = vclz %v2289_v21  ;;  %vm1223_vm14 = vcmp.eq.s32.totalorder %v1218_v55, 2  ;;  %vm1220_vm1 = vcmp.eq.s32.totalorder %v1218_v55, 0  ;;  %vm1219_vm3 = vcmp.lt.s32.totalorder %v1218_v55, 2  ;;  %v2305_v21 = vld [vmem:[%s3436_s8 + $0x1] ss:$0 sm:$0xff] }
 0x26e   : > { %v2290_v24 = vadd.s32 4294967294, %v1192_v22 }
 0x270   : > { %vm2291_vm9 = vcmp.lt.s32.totalorder %v2290_v24, 0 }
 0x271   : > { %v1195_v25 = vsel %vm2291_vm9, 0, %v2290_v24 }
 0x272   : > { %v1196_v28 = vsub.s32 32, %v1195_v25  ;;  %v1200_v30 = vsub.s32 4294967266, %v1195_v25  ;;  %v1197_v31 = vshll.u32 %v1188_v19, %v1195_v25 }
 0x274   : > { %v1198_v33 = vshrl.u32 %v1180_v26, %v1196_v28  ;;  %v1201_v34 = vadd.s32 127, %v1200_v30 }
 0x276   : > { %v1199_v35 = vor.u32 %v1198_v33, %v1197_v31  ;;  %v1202_v36 = vshll.u32 %v1201_v34, 23 }
 0x278   : > { %v1203_v37 = vor.u32 4788187, %v1202_v36  ;;  %v1206_v41 = vcvt.s32.f32 %v1199_v35 }
 0x27a   : > { %v1204_v39 = vand.u32 2147483647, %v1203_v37 }
 0x27c   : > { %v1207_v42 = vmul.f32 %v1206_v41, %v1204_v39 }
 0x27e   : > { %v1208_v44 = vxor.u32 2147483648, %v1207_v42 }
 0x280   : > { %v1209_v47 = vsel %vm1126_vm10, %v1208_v44, %v1207_v42 }
 0x281   : > { %v1212_v48 = vsel %vm1125_vm12, %v3273_v23, %v1209_v47  ;;  %v1498_v23 = vld [vmem:[#allocation14 + $0x18] sm:$0xff] }
 0x282   : > { %2601 = vcosq.f32 %v1212_v48 }
 0x283   : > { %2603 = vsinq.f32 %v1212_v48 }
 0x28f   : > { %v2602_v56 = vpop.eup %2601 }
 0x290   : > { %v2604_v57 = vpop.eup %2603  ;;  %v1224_v58 = vxor.u32 2147483648, %v2602_v56 }
 0x291   : > { %v1221_v59 = vxor.u32 2147483648, %v2604_v57 }
 0x292   : > { %v1328_v60 = vsel %vm1326_vm13, %v1224_v58, %v2604_v57  ;;  %v1225_v29 = vsel %vm1223_vm14, %v1224_v58, %v2604_v57 }
 0x293   : > { %v1325_v32 = vsel %vm1323_vm15, %v2602_v56, %v1221_v59  ;;  %v1222_v61 = vsel %vm1220_vm1, %v2602_v56, %v1221_v59 }
 0x294   : > { %v1329_v62 = vsel %vm1322_vm2, %v1325_v32, %v1328_v60  ;;  %v1226_v63 = vsel %vm1219_vm3, %v1222_v61, %v1225_v29 }
 0x295   : > { %v1330_v2 = vsel %vm1216_vm4, nan, %v1329_v62  ;;  %v1227_v3 = vsel %vm1216_vm4, nan, %v1226_v63 }
 0x296   : > { %2390 = vmatmul.mubr.msk.f32.vlgmr.msra.gmra.mxu0 %vm812_vm11, %v1330_v2  ;;  %2397 = vmatmul.mubr.msk.f32.vlgmr.msra.gmra.mxu1 %vm812_vm11, %v1227_v3 }
 0x297   : > { %2400 = vmatpush3.msra.mxu0 %v2300_v0  ;;  %2407 = vmatpush3.msra.mxu1 %v1487_v1 }
 0x298   : > { %2401 = vmatprep.subr.mxu0 %v2939_v6  ;;  %2408 = vmatprep.subr.mxu1 %v2939_v6 }
 0x299   : > { %2402 = vmatpush3.msra.mxu0 %v2299_v4  ;;  %2409 = vmatpush3.msra.mxu1 %v1486_v5 }
 0x29a   : > { %2403 = vmatprep.mubr.msk.f32.mxu0 %vm2940_vm0, %v2939_v6  ;;  %2410 = vmatprep.mubr.msk.f32.mxu1 %vm2940_vm0, %v2939_v6 }
 0x29b   : > { %2404 = vmatmul.mubr.msk.f32.vlgmr.msra.gmra.mxu0 %vm812_vm11, %v1330_v2  ;;  %2411 = vmatmul.mubr.msk.f32.vlgmr.msra.gmra.mxu1 %vm812_vm11, %v1227_v3 }
 0x29c   : > { %2413 = vmatprep.subr.mxu0 %v2939_v6  ;;  %2420 = vmatprep.subr.mxu1 %v2939_v6 }
 0x29d   : > { %2417 = vmatprep.mubr.msk.f32.mxu0 %vm2940_vm0, %v2939_v6  ;;  %2424 = vmatprep.mubr.msk.f32.mxu1 %vm2940_vm0, %v2939_v6 }
 0x29e   : > { %2414 = vmatpush3.msra.mxu0 %v1498_v23  ;;  %2421 = vmatpush3.msra.mxu1 %v1495_v27 }
 0x29f   : > { %2415 = vmatprep.subr.mxu0 %v2939_v6  ;;  %2422 = vmatprep.subr.mxu1 %v2939_v6 }
 0x2a0   : > { %2416 = vmatpush3.msra.mxu0 %v1497_v7  ;;  %2423 = vmatpush3.msra.mxu1 %v1494_v8 }
 0x2a1   : > { %2427 = vmatprep.subr.mxu0 %v2939_v6 }
 0x356   : > { %v1400_v10 = vpop.f32.mrf.mxu0  ;;  %v1473_v12 = vpop.f32.mrf.mxu1 }
 0x357   : > { %v1474_v13 = vadd.f32 %v1473_v12, %v1400_v10 }
 0x358   : > { %v2391_v14 = vpop.f32.mrf.mxu0  ;;  %v2398_v15 = vpop.f32.mrf.mxu1 }
 0x359   : > { %v1483_v18 = vadd.f32 %v2298_v11, %v1474_v13 }
 0x35b   : > { %v3334_v19 = vadd.f32 %v1483_v18, %v966_v16  ;;  %v1567_v20 = vpop.f32.mrf.mxu0  ;;  %v1637_v22 = vpop.f32.mrf.mxu1 }
 0x35c   : > { %v1638_v24 = vadd.f32 %v1637_v22, %v1567_v20 }
 0x35d   : > { %v2405_v25 = vpop.f32.mrf.mxu0  ;;  %v2412_v26 = vpop.f32.mrf.mxu1 }
 0x35e   : > { %v3339_v28 = vadd.f32 %v2305_v21, %v1638_v24 }
 0x360   : > { %v1651_v30 = vand.u32 2139095040, %v3339_v28  ;;  %v1648_v17 = vand.u32 2147483647, %v3339_v28  ;;  %vm1650_vm13 = vcmp.lt.s32.totalorder %v3339_v28, 0 }
 0x362   : > { %v1652_v31 = vshrl.u32 %v1651_v30, 23  ;;  %v1655_v37 = vand.u32 8388607, %v1648_v17  ;;  %vm1649_vm14 = vcmp.le.f32.partialorder %v1648_v17, 0.7853982 }
 0x364   : > { %v2306_v33 = vadd.s32 4294967169, %v1652_v31  ;;  %v1656_v56 = vor.u32 8388608, %v1655_v37 }
 0x366   : > { %v1658_v34 = vadd.s32 1, %v2306_v33 }
 0x368   : > { %vm1659_vm5 = vcmp.gt.s32.totalorder %v1658_v34, 0 }
 0x369   : > { %v1660_v35 = vsel %vm1659_vm5, %v1658_v34, 0 }
 0x36a   : > { %v1662_v36 = vand.u32 31, %v1660_v35  ;;  %v1661_v41 = vshrl.u32 %v1660_v35, 5 }
 0x36c   : > { %v1663_v39 = vsub.s32 32, %v1662_v36  ;;  %v1665_v42 = vshll.u32 %v2941_v38, %v1662_v36  ;;  %v1668_v44 = vshll.u32 %v2942_v40, %v1662_v36  ;;  %v1671_v48 = vshll.u32 %v2943_v43, %v1662_v36 }
 0x36d   : > { %v1674_v51 = vshll.u32 %v2944_v46, %v1662_v36  ;;  %v1677_v54 = vshll.u32 %v2945_v49, %v1662_v36  ;;  %vm1680_vm6 = vcmp.lt.s32.totalorder %v1661_v41, 1  ;;  %vm1683_vm7 = vcmp.lt.s32.totalorder %v1661_v41, 4 }
 0x36e   : > { %v1666_v45 = vshrl.u32 %v2942_v40, %v1663_v39  ;;  %v1669_v47 = vshrl.u32 %v2943_v43, %v1663_v39  ;;  %v1672_v50 = vshrl.u32 %v2944_v46, %v1663_v39  ;;  %v1675_v53 = vshrl.u32 %v2945_v49, %v1663_v39 }
 0x36f   : > { %v1678_v55 = vshrl.u32 %v2946_v52, %v1663_v39  ;;  %v1664_v61 = vshrl.u32 %v2941_v38, %v1663_v39  ;;  %vm1682_vm8 = vcmp.lt.s32.totalorder %v1661_v41, 3  ;;  %vm1681_vm9 = vcmp.lt.s32.totalorder %v1661_v41, 2 }
 0x370   : > { %v1667_v57 = vor.u32 %v1666_v45, %v1665_v42  ;;  %v1670_v58 = vor.u32 %v1669_v47, %v1668_v44  ;;  %v1673_v59 = vor.u32 %v1672_v50, %v1671_v48  ;;  %v1676_v60 = vor.u32 %v1675_v53, %v1674_v51 }
 0x371   : > { %v1679_v40 = vor.u32 %v1678_v55, %v1677_v54  ;;  %v1696_v52 = vshll.u32 %v1656_v56, 8 }
 0x372   : > { %v1685_v29 = vsel %vm1683_vm7, %v1673_v59, 2102212464  ;;  %v1688_v43 = vsel %vm1680_vm6, %v1667_v57, %v1670_v58  ;;  %v1692_v32 = vsel %vm1680_vm6, %v1670_v58, %v1673_v59  ;;  %v1689_v46 = vsel %vm1683_vm7, %v1676_v60, 920167782 }
 0x373   : > { %v1693_v62 = vsel %vm1683_vm7, %v1679_v40, 1326507024  ;;  %v1690_v49 = vsel %vm1682_vm8, %v1673_v59, %v1689_v46  ;;  %v1684_v0 = vsel %vm1680_vm6, %v1664_v61, %v1667_v57  ;;  %v1686_v1 = vsel %vm1682_vm8, %v1670_v58, %v1685_v29  ;;  %v2012_v61 = vld [vmem:[#allocation16 + $0x18] sm:$0xff]  ;;  %v2011_v46 = vld [vmem:[#allocation16 + $0x10] sm:$0xff] }
 0x374   : > { %v1694_v63 = vsel %vm1682_vm8, %v1676_v60, %v1693_v62  ;;  %v1691_v2 = vsel %vm1681_vm9, %v1688_v43, %v1690_v49  ;;  %v1687_v7 = vsel %vm1681_vm9, %v1684_v0, %v1686_v1  ;;  %vm1740_vm6 = vweird.f32 %v3339_v28  ;;  %v2009_v62 = vld [vmem:[#allocation16] sm:$0xff] }
 0x375   : > { %v1695_v3 = vsel %vm1681_vm9, %v1692_v32, %v1694_v63  ;;  %v3359_v23 = vmul.u32.u64.low %v1696_v52, %v1691_v2  ;;  %v3360_v27 = vmul.u32.u64.high %v1696_v52, %v1691_v2, %v3359_v23  ;;  %v1703_v8 = vmul.u32 %v1696_v52, %v1687_v7  ;;  %v2316_v63 = vld [vmem:[%s3439_s11 + $0x1] ss:$0 sm:$0xff] }
 0x376   : > { %v3356_v4 = vmul.u32.u64.low %v1696_v52, %v1695_v3  ;;  %v3357_v5 = vmul.u32.u64.high %v1696_v52, %v1695_v3, %v3356_v4 }
 0x377   : > { %v1706_v38 = vadd.s32 1, %v3360_v27 }
 0x378   : > { %vm1705_vm10 = vc.u32 %v3357_v5, %v3359_v23  ;;  %v1704_v22 = vadd.s32 %v3359_v23, %v3357_v5 }
 0x379   : > { %v1707_v9 = vsel %vm1705_vm10, %v1706_v38, %v3360_v27 }
 0x37a   : > { %v1708_v10 = vadd.s32 %v1707_v9, %v1703_v8 }
 0x37c   : > { %v1709_v11 = vadd.s32 536870912, %v1708_v10 }
 0x37e   : > { %v1710_v12 = vshrl.u32 %v1709_v11, 30 }
 0x380   : > { %v1711_v13 = vshll.u32 %v1710_v12, 30  ;;  %v1734_v42 = vsub.s32 4, %v1710_v12 }
 0x382   : > { %v1712_v14 = vsub.s32 %v1708_v10, %v1711_v13  ;;  %v1735_v47 = vsel %vm1650_vm13, %v1734_v42, %v1710_v12 }
 0x383   : > { %v1737_v48 = vsel %vm1649_vm14, 0, %v1735_v47 }
 0x384   : > { %v1714_v15 = vsub.s32 0, %v1712_v14  ;;  %v1741_v50 = vadd.s32 3, %v1737_v48  ;;  %v1845_v51 = vand.u32 3, %v1737_v48 }
 0x386   : > { %v2307_v16 = vmin.u32 %v1714_v15, %v1712_v14  ;;  %v1742_v53 = vand.u32 3, %v1741_v50  ;;  %vm1850_vm15 = vcmp.eq.s32.totalorder %v1845_v51, 2  ;;  %vm1847_vm2 = vcmp.eq.s32.totalorder %v1845_v51, 0 }
 0x387   : > { %vm1846_vm4 = vcmp.lt.s32.totalorder %v1845_v51, 2 }
 0x388   : > { %v1716_v18 = vclz %v2307_v16  ;;  %vm1747_vm1 = vcmp.eq.s32.totalorder %v1742_v53, 2  ;;  %vm1744_vm3 = vcmp.eq.s32.totalorder %v1742_v53, 0  ;;  %vm1743_vm5 = vcmp.lt.s32.totalorder %v1742_v53, 2 }
 0x38a   : > { %v2308_v20 = vadd.s32 4294967294, %v1716_v18 }
 0x38c   : > { %vm2309_vm12 = vcmp.lt.s32.totalorder %v2308_v20, 0 }
 0x38d   : > { %v1719_v21 = vsel %vm2309_vm12, 0, %v2308_v20 }
 0x38e   : > { %v1720_v24 = vsub.s32 32, %v1719_v21  ;;  %v1724_v25 = vsub.s32 4294967266, %v1719_v21  ;;  %v1721_v26 = vshll.u32 %v1712_v14, %v1719_v21 }
 0x390   : > { %v1722_v30 = vshrl.u32 %v1704_v22, %v1720_v24  ;;  %v1725_v31 = vadd.s32 127, %v1724_v25 }
 0x392   : > { %v1723_v33 = vor.u32 %v1722_v30, %v1721_v26  ;;  %v1726_v34 = vshll.u32 %v1725_v31, 23 }
 0x394   : > { %v1727_v35 = vor.u32 4788187, %v1726_v34  ;;  %v1730_v37 = vcvt.s32.f32 %v1723_v33 }
 0x396   : > { %v1728_v36 = vand.u32 2147483647, %v1727_v35 }
 0x398   : > { %v1731_v39 = vmul.f32 %v1730_v37, %v1728_v36 }
 0x39a   : > { %v1732_v41 = vxor.u32 2147483648, %v1731_v39 }
 0x39c   : > { %v1733_v44 = vsel %vm1650_vm13, %v1732_v41, %v1731_v39 }
 0x39d   : > { %v1736_v45 = vsel %vm1649_vm14, %v3339_v28, %v1733_v44  ;;  %v2010_v28 = vld [vmem:[#allocation16 + $0x8] sm:$0xff] }
 0x39e   : > { %2605 = vcosq.f32 %v1736_v45 }
 0x39f   : > { %2607 = vsinq.f32 %v1736_v45 }
 0x3ab   : > { %v2606_v54 = vpop.eup %2605 }
 0x3ac   : > { %v2608_v55 = vpop.eup %2607  ;;  %v1748_v56 = vxor.u32 2147483648, %v2606_v54 }
 0x3ad   : > { %v1745_v57 = vxor.u32 2147483648, %v2608_v55 }
 0x3ae   : > { %v1852_v58 = vsel %vm1850_vm15, %v1748_v56, %v2608_v55  ;;  %v1749_v17 = vsel %vm1747_vm1, %v1748_v56, %v2608_v55 }
 0x3af   : > { %v1849_v59 = vsel %vm1847_vm2, %v2606_v54, %v1745_v57  ;;  %v1746_v60 = vsel %vm1744_vm3, %v2606_v54, %v1745_v57 }
 0x3b0   : > { %v1853_v40 = vsel %vm1846_vm4, %v1849_v59, %v1852_v58  ;;  %v1750_v29 = vsel %vm1743_vm5, %v1746_v60, %v1749_v17 }
 0x3b1   : > { %v1854_v43 = vsel %vm1740_vm6, nan, %v1853_v40  ;;  %v1751_v32 = vsel %vm1740_vm6, nan, %v1750_v29 }
 0x3b2   : > { %2418 = vmatmul.mubr.msk.f32.vlgmr.msra.gmra.mxu0 %vm812_vm11, %v1854_v43  ;;  %2425 = vmatmul.mubr.msk.f32.vlgmr.msra.gmra.mxu1 %vm812_vm11, %v1751_v32 }
 0x3b3   : > { %2435 = vmatprep.mubr.msk.f32.mxu0 %vm2940_vm0, %v2939_v6  ;;  %2428 = vmatpush3.msra.mxu0 %v2012_v61  ;;  %vm2013_vm0 = vcmask 261120  }
 0x3b4   : > { %2429 = vmatprep.subr.mxu0 %v2939_v6 }
 0x3b5   : > { %2430 = vmatpush3.msra.mxu0 %v2011_v46 }
 0x3b6   : > { %2431 = vmatprep.subr.mxu0 %v2939_v6 }
 0x3b7   : > { %2432 = vmatpush3.msra.mxu0 %v2010_v28 }
 0x3b8   : > { %2433 = vmatprep.subr.mxu0 %v2939_v6 }
 0x3b9   : > { %2434 = vmatpush3.msra.mxu0 %v2009_v62 }
 0x472   : > { %v1924_v49 = vpop.f32.mrf.mxu0  ;;  %v1997_v52 = vpop.f32.mrf.mxu1 }
 0x473   : > { %v1998_v0 = vadd.f32 %v1997_v52, %v1924_v49 }
 0x474   : > { %v2419_v1 = vpop.f32.mrf.mxu0  ;;  %v2426_v2 = vpop.f32.mrf.mxu1 }
 0x475   : > { %v2007_v3 = vadd.f32 %v2316_v63, %v1998_v0 }
 0x477   : > { %v2008_v4 = vadd.f32 %v2007_v3, %v3334_v19 }
 0x479   : > { %2436 = vmatmul.mubr.msk.f32.vlgmr.msra.gmra.mxu0 %vm2013_vm0, %v2008_v4 }
 0x539   : > { %v2083_v6 = vpop.f32.mrf.mxu0 }
 0x53a   : > { %2087 = vst [vmem:[%s556_s2] sm:$0xff] %v2083_v6 }
 0x53b   : > { %v2437_v5 = vpop.f32.mrf.mxu0 }
 0x53c   : > { %2856 = shalt.err (!%p2853_p12)
}
 0x53d   : > { %s2857_s16 = scalar_lea.hbm %s3389_s17, 128  ;;  %s2861_s19 = scalar_lea.hbm %s3441_s13, 256 }
 0x53e   : > { %p2858_p10 = scmp.ne.s32.totalorder %s3389_s17, %s2857_s16  ;;  %p2862_p8 = scmp.lt.s32.totalorder %s3389_s17, %s3441_s13 }
 0x53f   : > { %p2863_p7 = scmp.lt.s32.totalorder %s2861_s19, %s2857_s16 }
 0x540   : > { %p2859_p4 = pnand %p2858_p10, %p3056_p5 }
 0x541   : > { %p2864_p11 = por %p2863_p7, %p2862_p8 }
 0x542   : > { %p2860_p9 = pneg %p2859_p4 }
 0x544   : > { %p2865_p13 = pnand %p2864_p11, %p2860_p9 }
 0x546   : > { %2868 = shalt.err (!%p2865_p13)
}
 0x547   : > { %2486 = dma.vmem_to_hbm [thread:$0]  (%p3056_p5), %s3384_s14, 128, %s3389_s17, %s2089_s20  }
 0x548 PF: > { %p2538_p0 = scmp.ge.s32.totalorder %s2923_s28, 2  ;;  %s2114_s24 = sand.u32 1, %s2911_s25  }
 0x549   : > { %s2115_s23 = scalar_lea.sflag [#allocation4], %s2114_s24 }
 0x54a   : > { %p2517_p1 = pnand %p2538_p0, %p3060_p6 }
 0x54c   : > { %p2518_p3 = pneg %p2517_p1 }
 0x54e   : > { %2906 = dma.done.wait (%p2518_p3), %s2115_s23, 128  }
 0x54f   : > { %2908 = vsyncadd (%p2518_p3), %s2115_s23, 4294967168  ;;  %s3474_s28 = sld [smem:[#allocation25_spill]]  ;;  %s3477_s25 = smov %s2915_s26 }
 0x550   : > { %s3475_s29 = sld [smem:[#allocation24_spill]] }
 0x551   : > { %s3476_s27 = sld [smem:[#allocation26_spill]] }
 0x555   : > { %p28_p2 = scmp.ge.s32.totalorder %s3474_s28, 4  }
 0x556   : > { %s3478_s26 = smov %s3475_s29 }
 0x557   :  { %30 = sbr.rel (!%p28_p2) target bundleno = 11 (0xb), region = 150 }
 0x55c   :  { %2120 = vsyncpa [#allocation3], 1 }
 0x55d   :  { %2122 = vsyncpa [#allocation3 + $0x1], 1 }
 0x55e   :  { %2123 = vsyncpa [#allocation6], 1 }
 0x55f   :  { %2124 = vsyncpa [#allocation9], 1 }
 0x560   :  { %2125 = vsyncpa [#allocation12], 1 }
 0x561   :  { %2126 = vsyncpa [#allocation15], 1 }
 0x562   :  { %2127 = vsyncpa [#allocation4], 1 }
 0x563   :  { %2129 = vsyncpa [#allocation4 + $0x1], 1 }

// kernel: tpu_custom_call.1
= control target key start
LH: loop header
LB: loop body
LE: loop exit
PB: predicated region body
PF: predicated region fallthrough
CT: control target
= control target key end

     0   :  { %s3428_s0 = inlined_call_operand.vmem [shape: f32[16,3], index: 0, kind: input, shape index: {}]   ;;  %s3429_s1 = inlined_call_operand.hbm [shape: f32[3,16], index: 1, kind: input, shape index: {}]   ;;  %s3430_s2 = inlined_call_operand.hbm [shape: f32[1,16], index: 2, kind: input, shape index: {}]   ;;  %s3431_s3 = inlined_call_operand.hbm [shape: f32[16,32], index: 3, kind: input, shape index: {}]   ;;  %s3432_s4 = inlined_call_operand.hbm [shape: f32[16,32], index: 4, kind: input, shape index: {}]   ;;  %s3433_s5 = inlined_call_operand.hbm [shape: f32[1,32], index: 5, kind: input, shape index: {}]   ;;  %s3434_s6 = inlined_call_operand.hbm [shape: f32[2,16,16], index: 6, kind: input, shape index: {}]   ;;  %s3435_s7 = inlined_call_operand.vmem [shape: f32[2,16,16], index: 7, kind: input, shape index: {}]   ;;  %s3436_s8 = inlined_call_operand.vmem [shape: f32[2,1,16], index: 8, kind: input, shape index: {}]   ;;  %s3437_s9 = inlined_call_operand.hbm [shape: f32[2,16,32], index: 9, kind: input, shape index: {}]   ;;  %s3438_s10 = inlined_call_operand.hbm [shape: f32[2,16,32], index: 10, kind: input, shape index: {}]   ;;  %s3439_s11 = inlined_call_operand.vmem [shape: f32[2,1,32], index: 11, kind: input, shape index: {}]   ;;  %s3440_s12 = inlined_call_operand.hbm [shape: f32[32,128], index: 12, kind: input, shape index: {}]   ;;  %s3441_s13 = inlined_call_operand.hbm [shape: f32[16,128], index: 13, kind: output, shape index: {}]  }
   0x1   :  { %3449 = sst [smem:[#allocation28_spill]] %s3430_s2 }
   0x2   :  { %3450 = sst [smem:[#allocation29_spill]] %s3432_s4 }
   0x3   :  { %18 = vsyncpa [#allocation3], 0 }
   0x4   :  { %19 = vsyncpa [#allocation6], 0 }
   0x5   :  { %20 = vsyncpa [#allocation9], 0 }
   0x6   :  { %21 = vsyncpa [#allocation12], 0 }
   0x7   :  { %22 = vsyncpa [#allocation15], 0 }
   0x8   :  { %23 = vsyncpa [#allocation4], 0 }
   0x9   :  { %25 = vsyncpa [#allocation4 + $0x1], 0  ;;  %s3018_s25 = smov 0   ;;  %s3020_s26 = smov 0  }
   0xa   :  { %s3022_s27 = smov 0   ;;  %s3024_s28 = smov 0  }
   0xb LB: > { %3451 = sst [smem:[#allocation24_spill]] %s2919_s27  ;;  %s3039_s29 = sadd.s32 4294967295, %s2923_s28   ;;  %s2923_s28 = sphi %s3024_s28, %s3474_s28   ;;  %s2919_s27 = sphi %s3022_s27, %s3476_s27   ;;  %s2915_s26 = sphi %s3020_s26, %s3478_s26   ;;  %s2911_s25 = sphi %s3018_s25, %s3477_s25  }
   0xc   : > { %s2249_s30 = sadd.s32 4294967294, %s2923_s28   ;;  %s3043_s14 = sadd.s32 1, %s2923_s28  }
   0xd   : > { %3452 = sst [smem:[#allocation25_spill]] %s3043_s14  ;;  %s316_s15 = sadd.s32 1, %s2919_s27 }
   0xe   : > { %s313_s16 = ssub.s32 %s2923_s28, %s3043_s14  ;;  %p326_p0 = scmp.ne.s32.totalorder %s2919_s27, %s2915_s26 }
   0xf   : > { %p314_p1 = scmp.eq.s32.totalorder %s313_s16, 0  ;;  %p327_p2 = scmp.eq.s32.totalorder %s3039_s29, 1 }
  0x10   : > { %p332_p3 = scmp.ne.s32.totalorder %s2915_s26, %s2911_s25  ;;  %p333_p4 = scmp.eq.s32.totalorder %s2249_s30, 1 }
  0x11   : > { %s3054_s17 = scalar_select %p314_p1, %s2919_s27, %s316_s15  }
  0x12   : > { %p3056_p5 = por %p327_p2, %p326_p0  ;;  %p3060_p6 = por %p333_p4, %p332_p3 }
  0x13   : > { %3453 = sst [smem:[#allocation26_spill]] %s3054_s17  ;;  %p2250_p7 = scmp.ge.s32.totalorder %s2923_s28, 1 }
  0x14   : > { %s3455_s19 = scalar_select %p3060_p6, 1, 0 }
  0x15   : > { %p340_p8 = scmp.lt.s32.totalorder %s2923_s28, 3  ;;  %p3445_p9 = scmp.eq.s32.totalorder %s3039_s29, 0 }
  0x16   : > { %3456 = sst [smem:[#allocation27_spill]] %s3455_s19  ;;  %s2925_s21 = smov [#allocation5]  }
  0x17   : > { %p3067_p10 = pnand %p2250_p7, %p340_p8  ;;  %s364_s22 = sshll.u32 %s2925_s21, 4  ;;  %s365_s22 = int_to_ptr.vmem [resolvable:$true] %s364_s22 }
  0x18   : > { %s2926_s24 = smov [#allocation8]   ;;  %s2927_s15 = smov [#allocation11]  }
  0x19   : > { %p2488_p11 = pneg %p3067_p10  ;;  %s387_s30 = sshll.u32 %s2926_s24, 4  ;;  %s3079_s30 = int_to_ptr.vmem [resolvable:$true] %s387_s30 }
  0x1a   : > { %s411_s16 = sshll.u32 %s2927_s15, 4  ;;  %s2620_s21 = scalar_lea.vmem %s365_s22, 16  ;;  %s412_s16 = int_to_ptr.vmem [resolvable:$true] %s411_s16 }
  0x1b   : > { %p3075_p12 = pnand %p3445_p9, %p2488_p11  ;;  %p2621_p0 = scmp.ne.s32.totalorder %s365_s22, %s2620_s21 }
  0x1c   : > { %s2627_s27 = scalar_lea.vmem %s365_s22, 32  ;;  %p2628_p3 = scmp.lt.s32.totalorder %s365_s22, %s365_s22 }
  0x1d   : > { %p3083_p13 = pneg %p3075_p12  ;;  %p2629_p4 = scmp.lt.s32.totalorder %s2627_s27, %s2620_s21 }
  0x1f   : > { %p2623_p1 = pnand %p2621_p0, %p3083_p13  ;;  %p2630_p7 = por %p2629_p4, %p2628_p3 }
  0x21   : > { %p2624_p2 = pneg %p2623_p1 }
  0x23   : > { %p2631_p8 = pnand %p2630_p7, %p2624_p2 }
  0x25   : > { %2634 = shalt.err (!%p2631_p8)
}
  0x26   : > { %s3460_s2 = sld [smem:[#allocation28_spill]]  ;;  %s2646_s14 = scalar_lea.vmem %s3079_s30, 256 }
  0x27   : > { %p2647_p11 = scmp.ne.s32.totalorder %s3079_s30, %s2646_s14  ;;  %p2654_p9 = scmp.lt.s32.totalorder %s3079_s30, %s3079_s30 }
  0x28   : > { %p2655_p3 = scmp.lt.s32.totalorder %s2646_s14, %s2646_s14 }
  0x29   : > { %p2649_p0 = pnand %p2647_p11, %p3083_p13 }
  0x2a   : > { %p2656_p2 = por %p2655_p3, %p2654_p9 }
  0x2b   : > { %p2650_p1 = pneg %p2649_p0 }
  0x2c   : > { %2494 = dma.hbm_to_vmem [thread:$0]  (!%p3075_p12), %s3460_s2, 16, %s365_s22, [#allocation6]  }
  0x2d   : > { %p2657_p4 = pnand %p2656_p2, %p2650_p1 }
  0x2f   : > { %2660 = shalt.err (!%p2657_p4)
}
  0x30   : > { %s3447_s27 = smov 128   ;;  %s2929_s21 = smov 8  }
  0x31   : > { %s3461_s4 = sld [smem:[#allocation29_spill]]  ;;  %s2672_s15 = scalar_lea.vmem %s412_s16, 512 }
  0x32   : > { %p2673_p7 = scmp.ne.s32.totalorder %s412_s16, %s2672_s15  ;;  %p2680_p11 = scmp.lt.s32.totalorder %s412_s16, %s412_s16 }
  0x33   : > { %p2681_p0 = scmp.lt.s32.totalorder %s2672_s15, %s2672_s15 }
  0x34   : > { %p2675_p9 = pnand %p2673_p7, %p3083_p13 }
  0x35   : > { %p2682_p1 = por %p2681_p0, %p2680_p11 }
  0x36   : > { %p2676_p8 = pneg %p2675_p9 }
  0x37   : > { %2500 = dma.hbm_to_vmem [thread:$0]  (!%p3075_p12), %s3461_s4, 256, %s3079_s30, [#allocation9], %s3447_s27, %s3447_s27, %s2929_s21  }
  0x38   : > { %p2683_p3 = pnand %p2682_p1, %p2676_p8 }
  0x3a   : > { %2686 = shalt.err (!%p2683_p3)
}
  0x3b   : > { %2506 = dma.hbm_to_vmem [thread:$0]  (!%p3075_p12), %s3434_s6, 512, %s412_s16, [#allocation12], %s3447_s27, %s3447_s27, %s2929_s21  }
  0x3c   : > { %s2930_s30 = smov [#allocation14]   ;;  %s2931_s24 = smov [#allocation2]  }
  0x3d   : > { %s443_s22 = sshll.u32 %s2930_s30, 4  ;;  %s353_s4 = sshll.u32 %s2931_s24, 4  ;;  %s444_s22 = int_to_ptr.vmem [resolvable:$true] %s443_s22  ;;  %s354_s4 = int_to_ptr.vmem [resolvable:$true] %s353_s4 }
  0x3e   : > { %s2698_s19 = scalar_lea.vmem %s444_s22, 512  ;;  %p2706_p9 = scmp.lt.s32.totalorder %s444_s22, %s444_s22 }
  0x3f   : > { %p2699_p2 = scmp.ne.s32.totalorder %s444_s22, %s2698_s19  ;;  %p2707_p8 = scmp.lt.s32.totalorder %s2698_s19, %s2698_s19 }
  0x41   : > { %p2701_p4 = pnand %p2699_p2, %p3083_p13  ;;  %p2708_p11 = por %p2707_p8, %p2706_p9 }
  0x43   : > { %p2702_p7 = pneg %p2701_p4 }
  0x45   : > { %p2709_p0 = pnand %p2708_p11, %p2702_p7 }
  0x47   : > { %2712 = shalt.err (!%p2709_p0)
}
  0x48   : > { %2512 = dma.hbm_to_vmem [thread:$0]  (!%p3075_p12), %s3438_s10, 512, %s444_s22, [#allocation15], %s3447_s27, %s3447_s27, %s2929_s21  }
  0x49   : > { %s2724_s15 = scalar_lea.vmem %s354_s4, 64  ;;  %p2732_p4 = scmp.lt.s32.totalorder %s354_s4, %s354_s4 }
  0x4a   : > { %p2725_p1 = scmp.ne.s32.totalorder %s354_s4, %s2724_s15  ;;  %p2733_p9 = scmp.lt.s32.totalorder %s2724_s15, %s2724_s15 }
  0x4c   : > { %p2727_p3 = pnand %p2725_p1, %p3083_p13  ;;  %p2734_p7 = por %p2733_p9, %p2732_p4 }
  0x4e   : > { %p2728_p2 = pneg %p2727_p3 }
  0x50   : > { %p2735_p8 = pnand %p2734_p7, %p2728_p2 }
  0x52   : > { %2738 = shalt.err (!%p2735_p8)
}
  0x53   : > { %2491 = dma.hbm_to_vmem [thread:$0]  (!%p3075_p12), %s3429_s1, 64, %s354_s4, [#allocation3]  }
  0x54   : > { %s2932_s30 = smov [#allocation7]   ;;  %s2933_s24 = smov [#allocation10]  }
  0x55   : > { %s374_s22 = sshll.u32 %s2932_s30, 4  ;;  %s401_s2 = sshll.u32 %s2933_s24, 4  ;;  %s375_s22 = int_to_ptr.vmem [resolvable:$true] %s374_s22  ;;  %s402_s2 = int_to_ptr.vmem [resolvable:$true] %s401_s2 }
  0x56   : > { %s2750_s16 = scalar_lea.vmem %s375_s22, 256  ;;  %p2758_p3 = scmp.lt.s32.totalorder %s375_s22, %s375_s22 }
  0x57   : > { %p2751_p11 = scmp.ne.s32.totalorder %s375_s22, %s2750_s16  ;;  %p2759_p2 = scmp.lt.s32.totalorder %s2750_s16, %s2750_s16 }
  0x59   : > { %p2753_p0 = pnand %p2751_p11, %p3083_p13  ;;  %p2760_p4 = por %p2759_p2, %p2758_p3 }
  0x5b   : > { %p2754_p1 = pneg %p2753_p0 }
  0x5d   : > { %p2761_p9 = pnand %p2760_p4, %p2754_p1 }
  0x5f   : > { %2764 = shalt.err (!%p2761_p9)
}
  0x60   : > { %2497 = dma.hbm_to_vmem [thread:$0]  (!%p3075_p12), %s3431_s3, 256, %s375_s22, [#allocation6], %s3447_s27, %s3447_s27, %s2929_s21  }
  0x61   : > { %s2776_s19 = scalar_lea.vmem %s402_s2, 16  ;;  %s2783_s14 = scalar_lea.vmem %s402_s2, 32 }
  0x62   : > { %p2777_p7 = scmp.ne.s32.totalorder %s402_s2, %s2776_s19  ;;  %p2784_p0 = scmp.lt.s32.totalorder %s402_s2, %s402_s2 }
  0x63   : > { %p2785_p1 = scmp.lt.s32.totalorder %s2783_s14, %s2776_s19 }
  0x64   : > { %p2779_p8 = pnand %p2777_p7, %p3083_p13 }
  0x65   : > { %p2786_p3 = por %p2785_p1, %p2784_p0 }
  0x66   : > { %p2780_p11 = pneg %p2779_p8 }
  0x68   : > { %p2787_p2 = pnand %p2786_p3, %p2780_p11 }
  0x6a   : > { %2790 = shalt.err (!%p2787_p2)
}
  0x6b   : > { %2503 = dma.hbm_to_vmem [thread:$0]  (!%p3075_p12), %s3433_s5, 16, %s402_s2, [#allocation9]  }
  0x6c   : > { %s2934_s22 = smov [#allocation13]   ;;  %s2935_s4 = smov [#allocation16]  }
  0x6d   : > { %s430_s16 = sshll.u32 %s2934_s22, 4  ;;  %s459_s15 = sshll.u32 %s2935_s4, 4  ;;  %s431_s16 = int_to_ptr.vmem [resolvable:$true] %s430_s16  ;;  %s460_s15 = int_to_ptr.vmem [resolvable:$true] %s459_s15 }
  0x6e   : > { %s2802_s27 = scalar_lea.vmem %s431_s16, 512  ;;  %p2810_p8 = scmp.lt.s32.totalorder %s431_s16, %s431_s16 }
  0x6f   : > { %p2803_p4 = scmp.ne.s32.totalorder %s431_s16, %s2802_s27  ;;  %p2811_p11 = scmp.lt.s32.totalorder %s2802_s27, %s2802_s27 }
  0x71   : > { %p2805_p9 = pnand %p2803_p4, %p3083_p13  ;;  %p2812_p0 = por %p2811_p11, %p2810_p8 }
  0x73   : > { %p2806_p7 = pneg %p2805_p9 }
  0x75   : > { %p2813_p1 = pnand %p2812_p0, %p2806_p7 }
  0x77   : > { %2816 = shalt.err (!%p2813_p1)
}
  0x78   : > { %s3462_s19 = smov 128   ;;  %s2828_s30 = scalar_lea.vmem %s460_s15, 512 }
  0x79   : > { %2509 = dma.hbm_to_vmem [thread:$0]  (!%p3075_p12), %s3437_s9, 512, %s431_s16, [#allocation12], %s3462_s19, %s3462_s19, %s2929_s21  }
  0x7a   : > { %p2829_p3 = scmp.ne.s32.totalorder %s460_s15, %s2828_s30  ;;  %p2836_p9 = scmp.lt.s32.totalorder %s460_s15, %s460_s15 }
  0x7b   : > { %p2837_p8 = scmp.lt.s32.totalorder %s2828_s30, %s2828_s30 }
  0x7c   : > { %p2831_p2 = pnand %p2829_p3, %p3083_p13 }
  0x7d   : > { %p2838_p7 = por %p2837_p8, %p2836_p9 }
  0x7e   : > { %p2832_p4 = pneg %p2831_p2 }
  0x80   : > { %p2839_p11 = pnand %p2838_p7, %p2832_p4 }
  0x82   : > { %2842 = shalt.err (!%p2839_p11)
}
  0x83   : > { %2515 = dma.hbm_to_vmem [thread:$0]  (!%p3075_p12), %s3440_s12, 512, %s460_s15, [#allocation15], %s3462_s19, %s3462_s19, %s2929_s21  }
  0x84   : > { %482 = sbr.rel (%p3067_p10) target bundleno = 1352 (0x548), region = 72  ;;  %p3463_p13 = scmp.eq.s32.totalorder (!%p3067_p10), %s3039_s29, 0 }
  0x89   : > { %2886 = dma.done.wait (%p3463_p13), [#allocation3], 64   ;;  %p3464_p0 = pmov %p3463_p13 }
  0x8b   : > { %2888 = vsyncadd (%p3464_p0), [#allocation3], 4294967232  ;;  %p3465_p1 = pmov %p3464_p0 }
  0x8c   : > { %p3466_p3 = pmov %p3464_p0 }
  0x8d   : > { %2890 = dma.done.wait (%p3465_p1), [#allocation6], 272  }
  0x8e   : > { %2892 = vsyncadd (%p3466_p3), [#allocation6], 4294967024  ;;  %p3467_p2 = pmov %p3464_p0 }
  0x8f   : > { %p3468_p12 = pmov %p3464_p0 }
  0x90   : > { %2894 = dma.done.wait (%p3467_p2), [#allocation9], 272  }
  0x91   : > { %2896 = vsyncadd (%p3468_p12), [#allocation9], 4294967024  ;;  %p3469_p10 = pmov %p3464_p0 }
  0x92   : > { %p3470_p4 = pmov %p3464_p0 }
  0x93   : > { %2898 = dma.done.wait (%p3469_p10), [#allocation12], 1024  }
  0x94   : > { %2900 = vsyncadd (%p3470_p4), [#allocation12], 4294966272  ;;  %p3471_p9 = pmov %p3464_p0 }
  0x95   : > { %p3472_p8 = pmov %p3464_p0 }
  0x96   : > { %2902 = dma.done.wait (%p3471_p9), [#allocation15], 1024  }
  0x97   : > { %2904 = vsyncadd (%p3472_p8), [#allocation15], 4294966272  ;;  %p557_p7 = scmp.lt.s32.totalorder %s3039_s29, 1  ;;  %v2936_v0 = vmov 0   ;;  %v2937_v1 = vmov 2   ;;  %v2938_v3 = vmov 1   ;;  %v569_v9 = vlaneseq }
  0x98   : > { %2593 = vset.pattern.permute.xlu0 %v2936_v0  ;;  %2595 = vset.pattern.permute.xlu1 %v2937_v1  ;;  %v811_v4 = vld [vmem:[#allocation8 + $0x8] sm:$0xff]  ;;  %v970_v5 = vld [vmem:[%s3435_s7 + $0x8] sm:$0xff]  ;;  %v2939_v6 = vmov 0.0   ;;  %v810_v7 = vld [vmem:[#allocation8] sm:$0xff]  ;;  %vm2940_vm0 = vmmov 0   ;;  %vm812_vm11 = vcmask 130048  }
  0x99   : > { %s558_s17 = scalar_select %p557_p7, %s3039_s29, 1  ;;  %2357 = vmatprep.subr.mxu1 %v2939_v6  ;;  %2371 = vmatprep.subr.mxu0 %v2939_v6  ;;  %v969_v8 = vld [vmem:[%s3435_s7] sm:$0xff]  ;;  %v570_v10 = vshrl.u32 %v569_v9, 7  ;;  %v2941_v38 = vmov 683565275  }
  0x9a   : > { %2358 = vmatpush3.msra.mxu1 %v811_v4  ;;  %2372 = vmatpush3.msra.mxu0 %v970_v5  ;;  %v562_v12 = vld [vmem:[#allocation2] sm:$0x7]  ;;  %v2273_v20 = vld [vmem:[#allocation5] ss:$0 sm:$0xff]  ;;  %v2942_v40 = vmov 2475754826  }
  0x9b   : > { %s2272_s20 = sshll.u32 %s558_s17, 3  ;;  %2359 = vmatprep.subr.mxu1 %v2939_v6  ;;  %2373 = vmatprep.subr.mxu0 %v2939_v6  ;;  %v571_v11 = vsub.s32 0, %v570_v10  ;;  %v587_v14 = vsub.s32 1, %v570_v10  ;;  %v597_v15 = vsub.s32 2, %v570_v10  ;;  %v2943_v43 = vmov 2131351028  }
  0x9c   : > { %s560_s22 = scalar_lea.vmem %s3428_s0, %s2272_s20  ;;  %2360 = vmatpush3.msra.mxu1 %v810_v7  ;;  %2361 = vmatprep.mubr.msk.f32.mxu1 %vm2940_vm0, %v2939_v6  ;;  %v2944_v46 = vmov 2102212464   ;;  %v2945_v49 = vmov 920167782   ;;  %v2946_v52 = vmov 1326507024  }
  0x9d   : > { %v561_v2 = vld [vmem:[%s560_s22] sm:$0xff]  ;;  %2364 = vmatprep.subr.mxu1 %v2939_v6  ;;  %2374 = vmatpush3.msra.mxu0 %v969_v8  ;;  %v572_v13 = vrot.slane %v562_v12, %v571_v11  ;;  %v588_v18 = vrot.slane %v562_v12, %v587_v14  ;;  %v598_v19 = vrot.slane %v562_v12, %v597_v15  ;;  %s554_s15 = sand.u32 1, %s2915_s26   ;;  %s2319_s30 = sshll.u32 %s3039_s29, 7 }
  0x9e   : > { %566 = vperm.xlu0 %2593, %v561_v2   ;;  %592 = vperm.xlu1 %2595, %v561_v2   ;;  %s2271_s19 = sshll.u32 %s554_s15, 3  ;;  %s3389_s17 = scalar_lea.hbm %s3441_s13, %s2319_s30 }
  0x9f   : > { %2375 = vmatprep.mubr.msk.f32.mxu0 %vm2940_vm0, %v2939_v6  ;;  %2385 = vmatprep.subr.mxu0 %v2939_v6  ;;  %s556_s2 = scalar_lea.vmem [#allocation17], %s2271_s19  ;;  %s2089_s20 = scalar_lea.sflag [#allocation4], %s554_s15 }
  0xa0   : > { %s2102_s14 = sshll.u32 %s556_s2, 4  ;;  %s2947_s29 = smov [#allocation17]   ;;  %s3384_s14 = int_to_ptr.vmem [resolvable:$true] %s2102_s14 }
  0xa1   : > { %s2843_s23 = scalar_lea.vmem %s3384_s14, 128  ;;  %s2847_s21 = sshll.u32 %s2947_s29, 4  ;;  %s2848_s21 = int_to_ptr.vmem [resolvable:$false] %s2847_s21 }
  0xa2   : > { %2594 = vset.pattern.permute.xlu0 %v2938_v3  ;;  %p2844_p11 = scmp.ne.s32.totalorder %s3384_s14, %s2843_s23  ;;  %s2849_s22 = scalar_lea.vmem %s2848_s21, 256 }
  0xa3   : > { %582 = vperm.xlu0 %2594, %v561_v2   ;;  %p2850_p1 = scmp.lt.s32.totalorder %s3384_s14, %s2848_s21  ;;  %p2851_p3 = scmp.lt.s32.totalorder %s2849_s22, %s2843_s23 }
  0xa4   : > { %p2845_p13 = pnand %p2844_p11, %p3056_p5 }
  0xa5   : > { %p2852_p2 = por %p2851_p3, %p2850_p1 }
  0xa6   : > { %p2846_p0 = pneg %p2845_p13 }
  0xa7   : > { %2596 = vset.pattern.permute.xlu0 %v2937_v1 }
  0xa8   : > { %p2853_p12 = pnand %p2852_p2, %p2846_p0 }
 0x119   : > { %v567_v16 = vpop.permute.xlu0 %566  ;;  %v593_v21 = vpop.permute.xlu1 %592 }
 0x11a   : > { %v573_v17 = vmul.f32 %v572_v13, %v567_v16  ;;  %v599_v25 = vmul.f32 %v598_v19, %v593_v21 }
 0x11c   : > { %v580_v23 = vadd.f32 %v2273_v20, %v573_v17 }
 0x11e   : > { %v583_v22 = vpop.permute.xlu0 %582 }
 0x11f   : > { %v589_v24 = vmul.f32 %v588_v18, %v583_v22 }
 0x121   : > { %v590_v26 = vadd.f32 %v589_v24, %v580_v23 }
 0x123   : > { %v3216_v27 = vadd.f32 %v599_v25, %v590_v26 }
 0x125   : > { %v604_v28 = vand.u32 2139095040, %v3216_v27  ;;  %v601_v32 = vand.u32 2147483647, %v3216_v27  ;;  %vm603_vm8 = vcmp.lt.s32.totalorder %v3216_v27, 0 }
 0x127   : > { %v605_v29 = vshrl.u32 %v604_v28, 23  ;;  %v608_v35 = vand.u32 8388607, %v601_v32  ;;  %vm602_vm9 = vcmp.le.f32.partialorder %v601_v32, 0.7853982 }
 0x129   : > { %v2274_v30 = vadd.s32 4294967169, %v605_v29  ;;  %v609_v54 = vor.u32 8388608, %v608_v35 }
 0x12b   : > { %v611_v31 = vadd.s32 1, %v2274_v30  ;;  %v649_v4 = vshll.u32 %v609_v54, 8 }
 0x12d   : > { %vm612_vm1 = vcmp.gt.s32.totalorder %v611_v31, 0 }
 0x12e   : > { %v613_v33 = vsel %vm612_vm1, %v611_v31, 0  ;;  %vm693_vm1 = vweird.f32 %v3216_v27 }
 0x12f   : > { %v615_v34 = vand.u32 31, %v613_v33  ;;  %v614_v37 = vshrl.u32 %v613_v33, 5 }
 0x131   : > { %v616_v36 = vsub.s32 32, %v615_v34  ;;  %v618_v39 = vshll.u32 %v2941_v38, %v615_v34  ;;  %v621_v41 = vshll.u32 %v2942_v40, %v615_v34  ;;  %v624_v45 = vshll.u32 %v2943_v43, %v615_v34 }
 0x132   : > { %v627_v48 = vshll.u32 %v2944_v46, %v615_v34  ;;  %v630_v51 = vshll.u32 %v2945_v49, %v615_v34  ;;  %vm633_vm2 = vcmp.lt.s32.totalorder %v614_v37, 1  ;;  %vm636_vm3 = vcmp.lt.s32.totalorder %v614_v37, 4 }
 0x133   : > { %v619_v42 = vshrl.u32 %v2942_v40, %v616_v36  ;;  %v622_v44 = vshrl.u32 %v2943_v43, %v616_v36  ;;  %v625_v47 = vshrl.u32 %v2944_v46, %v616_v36  ;;  %v628_v50 = vshrl.u32 %v2945_v49, %v616_v36 }
 0x134   : > { %v631_v53 = vshrl.u32 %v2946_v52, %v616_v36  ;;  %v617_v63 = vshrl.u32 %v2941_v38, %v616_v36  ;;  %vm635_vm4 = vcmp.lt.s32.totalorder %v614_v37, 3  ;;  %vm634_vm5 = vcmp.lt.s32.totalorder %v614_v37, 2 }
 0x135   : > { %v620_v55 = vor.u32 %v619_v42, %v618_v39  ;;  %v623_v56 = vor.u32 %v622_v44, %v621_v41  ;;  %v626_v57 = vor.u32 %v625_v47, %v624_v45  ;;  %v629_v58 = vor.u32 %v628_v50, %v627_v48 }
 0x136   : > { %v632_v59 = vor.u32 %v631_v53, %v630_v51 }
 0x137   : > { %v638_v60 = vsel %vm636_vm3, %v626_v57, 2102212464  ;;  %v641_v61 = vsel %vm633_vm2, %v620_v55, %v623_v56  ;;  %v645_v62 = vsel %vm633_vm2, %v623_v56, %v626_v57  ;;  %v642_v0 = vsel %vm636_vm3, %v629_v58, 920167782 }
 0x138   : > { %v646_v1 = vsel %vm636_vm3, %v632_v59, 1326507024  ;;  %v643_v2 = vsel %vm635_vm4, %v626_v57, %v642_v0  ;;  %v637_v5 = vsel %vm633_vm2, %v617_v63, %v620_v55  ;;  %v639_v7 = vsel %vm635_vm4, %v623_v56, %v638_v60 }
 0x139   : > { %v647_v3 = vsel %vm635_vm4, %v629_v58, %v646_v1  ;;  %v644_v8 = vsel %vm634_vm5, %v641_v61, %v643_v2  ;;  %v640_v14 = vsel %vm634_vm5, %v637_v5, %v639_v7  ;;  %v809_v1 = vld [vmem:[#allocation7 + $0x8] sm:$0xff] }
 0x13a   : > { %v648_v9 = vsel %vm634_vm5, %v645_v62, %v647_v3  ;;  %v3236_v12 = vmul.u32.u64.low %v649_v4, %v644_v8  ;;  %v3237_v13 = vmul.u32.u64.high %v649_v4, %v644_v8, %v3236_v12  ;;  %v656_v16 = vmul.u32 %v649_v4, %v640_v14  ;;  %v968_v5 = vld [vmem:[#allocation11 + $0x8] sm:$0xff]  ;;  %v967_v7 = vld [vmem:[#allocation11] sm:$0xff] }
 0x13b   : > { %v3233_v10 = vmul.u32.u64.low %v649_v4, %v648_v9  ;;  %v3234_v11 = vmul.u32.u64.high %v649_v4, %v648_v9, %v3233_v10  ;;  %v808_v4 = vld [vmem:[#allocation7] sm:$0xff]  ;;  %v975_v8 = vld [vmem:[#allocation14 + $0x8] sm:$0xff] }
 0x13c   : > { %v659_v15 = vadd.s32 1, %v3237_v13  ;;  %v973_v9 = vld [vmem:[#allocation13 + $0x8] sm:$0xff]  ;;  %v974_v10 = vld [vmem:[#allocation14] sm:$0xff] }
 0x13d   : > { %vm658_vm6 = vc.u32 %v3234_v11, %v3236_v12  ;;  %v657_v29 = vadd.s32 %v3236_v12, %v3234_v11  ;;  %v972_v11 = vld [vmem:[#allocation13] sm:$0xff] }
 0x13e   : > { %v660_v17 = vsel %vm658_vm6, %v659_v15, %v3237_v13 }
 0x13f   : > { %v661_v18 = vadd.s32 %v660_v17, %v656_v16 }
 0x141   : > { %v662_v19 = vadd.s32 536870912, %v661_v18 }
 0x143   : > { %v663_v20 = vshrl.u32 %v662_v19, 30  ;;  %v2287_v19 = vld [vmem:[%s3436_s8] ss:$0 sm:$0xff] }
 0x145   : > { %v664_v21 = vshll.u32 %v663_v20, 30  ;;  %v687_v48 = vsub.s32 4, %v663_v20 }
 0x147   : > { %v665_v22 = vsub.s32 %v661_v18, %v664_v21  ;;  %v688_v51 = vsel %vm603_vm8, %v687_v48, %v663_v20 }
 0x148   : > { %v690_v53 = vsel %vm602_vm9, 0, %v688_v51 }
 0x149   : > { %v667_v23 = vsub.s32 0, %v665_v22  ;;  %v694_v54 = vadd.s32 3, %v690_v53  ;;  %v798_v55 = vand.u32 3, %v690_v53 }
 0x14b   : > { %v2275_v24 = vmin.u32 %v667_v23, %v665_v22  ;;  %v695_v56 = vand.u32 3, %v694_v54  ;;  %vm803_vm10 = vcmp.eq.s32.totalorder %v798_v55, 2  ;;  %vm800_vm14 = vcmp.eq.s32.totalorder %v798_v55, 0 }
 0x14c   : > { %vm799_vm15 = vcmp.lt.s32.totalorder %v798_v55, 2 }
 0x14d   : > { %v669_v25 = vclz %v2275_v24  ;;  %vm697_vm12 = vcmp.eq.s32.totalorder %v695_v56, 0  ;;  %vm700_vm13 = vcmp.eq.s32.totalorder %v695_v56, 2  ;;  %vm696_vm2 = vcmp.lt.s32.totalorder %v695_v56, 2 }
 0x14f   : > { %v2276_v26 = vadd.s32 4294967294, %v669_v25 }
 0x151   : > { %vm2277_vm7 = vcmp.lt.s32.totalorder %v2276_v26, 0 }
 0x152   : > { %v672_v28 = vsel %vm2277_vm7, 0, %v2276_v26 }
 0x153   : > { %v673_v30 = vsub.s32 32, %v672_v28  ;;  %v677_v31 = vsub.s32 4294967266, %v672_v28  ;;  %v674_v33 = vshll.u32 %v665_v22, %v672_v28 }
 0x155   : > { %v675_v34 = vshrl.u32 %v657_v29, %v673_v30  ;;  %v678_v35 = vadd.s32 127, %v677_v31 }
 0x157   : > { %v676_v36 = vor.u32 %v675_v34, %v674_v33  ;;  %v679_v37 = vshll.u32 %v678_v35, 23 }
 0x159   : > { %v680_v39 = vor.u32 4788187, %v679_v37  ;;  %v683_v42 = vcvt.s32.f32 %v676_v36 }
 0x15b   : > { %v681_v41 = vand.u32 2147483647, %v680_v39 }
 0x15d   : > { %v684_v44 = vmul.f32 %v683_v42, %v681_v41 }
 0x15f   : > { %v685_v45 = vxor.u32 2147483648, %v684_v44 }
 0x161   : > { %v686_v47 = vsel %vm603_vm8, %v685_v45, %v684_v44 }
 0x162   : > { %v689_v50 = vsel %vm602_vm9, %v3216_v27, %v686_v47 }
 0x163   : > { %2597 = vcosq.f32 %v689_v50 }
 0x164   : > { %2599 = vsinq.f32 %v689_v50 }
 0x170   : > { %v2598_v57 = vpop.eup %2597 }
 0x171   : > { %v2600_v58 = vpop.eup %2599  ;;  %v701_v59 = vxor.u32 2147483648, %v2598_v57 }
 0x172   : > { %v698_v60 = vxor.u32 2147483648, %v2600_v58 }
 0x173   : > { %v805_v32 = vsel %vm803_vm10, %v701_v59, %v2600_v58  ;;  %v702_v62 = vsel %vm700_vm13, %v701_v59, %v2600_v58 }
 0x174   : > { %v699_v61 = vsel %vm697_vm12, %v2598_v57, %v698_v60  ;;  %v802_v63 = vsel %vm800_vm14, %v2598_v57, %v698_v60 }
 0x175   : > { %v806_v0 = vsel %vm799_vm15, %v802_v63, %v805_v32  ;;  %v703_v3 = vsel %vm696_vm2, %v699_v61, %v702_v62 }
 0x176   : > { %v807_v2 = vsel %vm693_vm1, nan, %v806_v0  ;;  %v704_v27 = vsel %vm693_vm1, nan, %v703_v3 }
 0x177   : > { %2362 = vmatmul.mubr.msk.f32.vlgmr.msra.gmra.mxu1 %vm812_vm11, %v807_v2  ;;  %2376 = vmatmul.mubr.msk.f32.vlgmr.msra.gmra.mxu0 %vm812_vm11, %v807_v2 }
 0x178   : > { %2365 = vmatpush3.msra.mxu1 %v809_v1  ;;  %2368 = vmatprep.mubr.msk.f32.mxu1 %vm2940_vm0, %v2939_v6 }
 0x179   : > { %2366 = vmatprep.subr.mxu1 %v2939_v6  ;;  %2389 = vmatprep.mubr.msk.f32.mxu0 %vm2940_vm0, %v2939_v6 }
 0x17a   : > { %2367 = vmatpush3.msra.mxu1 %v808_v4  ;;  %2386 = vmatpush3.msra.mxu0 %v975_v8 }
 0x17b   : > { %2378 = vmatprep.subr.mxu1 %v2939_v6  ;;  %2369 = vmatmul.mubr.msk.f32.vlgmr.msra.gmra.mxu1 %vm812_vm11, %v704_v27 }
 0x17c   : > { %2379 = vmatpush3.msra.mxu1 %v968_v5  ;;  %2382 = vmatprep.mubr.msk.f32.mxu1 %vm2940_vm0, %v2939_v6 }
 0x17d   : > { %2380 = vmatprep.subr.mxu1 %v2939_v6  ;;  %2387 = vmatprep.subr.mxu0 %v2939_v6 }
 0x17e   : > { %2381 = vmatpush3.msra.mxu1 %v967_v7  ;;  %2388 = vmatpush3.msra.mxu0 %v974_v10 }
 0x17f   : > { %2383 = vmatmul.mubr.msk.f32.vlgmr.msra.gmra.mxu1 %vm812_vm11, %v704_v27  ;;  %2392 = vmatprep.subr.mxu1 %v2939_v6 }
 0x180   : > { %2396 = vmatprep.mubr.msk.f32.mxu1 %vm2940_vm0, %v2939_v6  ;;  %2393 = vmatpush3.msra.mxu1 %v973_v9 }
 0x181   : > { %2394 = vmatprep.subr.mxu1 %v2939_v6  ;;  %2399 = vmatprep.subr.mxu0 %v2939_v6 }
 0x182   : > { %2395 = vmatpush3.msra.mxu1 %v972_v11 }
 0x183   : > { %2406 = vmatprep.subr.mxu1 %v2939_v6 }
 0x237   : > { %v882_v12 = vpop.f32.mrf.mxu1  ;;  %v1043_v13 = vpop.f32.mrf.mxu0 }
 0x239   : > { %v2363_v14 = vpop.f32.mrf.mxu1  ;;  %v2377_v15 = vpop.f32.mrf.mxu0 }
 0x23b   : > { %v955_v16 = vpop.f32.mrf.mxu1 }
 0x23c   : > { %v3268_v17 = vadd.f32 %v955_v16, %v882_v12 }
 0x23d   : > { %v2370_v18 = vpop.f32.mrf.mxu1 }
 0x23f   : > { %v1113_v20 = vpop.f32.mrf.mxu1 }
 0x240   : > { %v1114_v21 = vadd.f32 %v1113_v20, %v1043_v13 }
 0x241   : > { %v2384_v22 = vpop.f32.mrf.mxu1 }
 0x242   : > { %v3273_v23 = vadd.f32 %v2287_v19, %v1114_v21 }
 0x244   : > { %v1127_v24 = vand.u32 2139095040, %v3273_v23  ;;  %v1124_v29 = vand.u32 2147483647, %v3273_v23  ;;  %vm1126_vm10 = vcmp.lt.s32.totalorder %v3273_v23, 0 }
 0x246   : > { %v1128_v25 = vshrl.u32 %v1127_v24, 23  ;;  %v1131_v33 = vand.u32 8388607, %v1124_v29  ;;  %vm1125_vm12 = vcmp.le.f32.partialorder %v1124_v29, 0.7853982 }
 0x248   : > { %v2288_v26 = vadd.s32 4294967169, %v1128_v25  ;;  %v1132_v51 = vor.u32 8388608, %v1131_v33 }
 0x24a   : > { %v1134_v28 = vadd.s32 1, %v2288_v26  ;;  %v1172_v1 = vshll.u32 %v1132_v51, 8 }
 0x24c   : > { %vm1135_vm3 = vcmp.gt.s32.totalorder %v1134_v28, 0 }
 0x24d   : > { %v1136_v30 = vsel %vm1135_vm3, %v1134_v28, 0 }
 0x24e   : > { %v1138_v31 = vand.u32 31, %v1136_v30  ;;  %v1137_v35 = vshrl.u32 %v1136_v30, 5 }
 0x250   : > { %v1139_v34 = vsub.s32 32, %v1138_v31  ;;  %v1141_v36 = vshll.u32 %v2941_v38, %v1138_v31  ;;  %v1144_v37 = vshll.u32 %v2942_v40, %v1138_v31  ;;  %v1147_v42 = vshll.u32 %v2943_v43, %v1138_v31 }
 0x251   : > { %v1150_v45 = vshll.u32 %v2944_v46, %v1138_v31  ;;  %v1153_v48 = vshll.u32 %v2945_v49, %v1138_v31  ;;  %vm1156_vm4 = vcmp.lt.s32.totalorder %v1137_v35, 1  ;;  %vm1159_vm5 = vcmp.lt.s32.totalorder %v1137_v35, 4 }
 0x252   : > { %v1142_v39 = vshrl.u32 %v2942_v40, %v1139_v34  ;;  %v1145_v41 = vshrl.u32 %v2943_v43, %v1139_v34  ;;  %v1148_v44 = vshrl.u32 %v2944_v46, %v1139_v34  ;;  %v1151_v47 = vshrl.u32 %v2945_v49, %v1139_v34 }
 0x253   : > { %v1154_v50 = vshrl.u32 %v2946_v52, %v1139_v34  ;;  %v1140_v32 = vshrl.u32 %v2941_v38, %v1139_v34  ;;  %vm1158_vm6 = vcmp.lt.s32.totalorder %v1137_v35, 3  ;;  %vm1157_vm7 = vcmp.lt.s32.totalorder %v1137_v35, 2 }
 0x254   : > { %v1143_v53 = vor.u32 %v1142_v39, %v1141_v36  ;;  %v1146_v54 = vor.u32 %v1145_v41, %v1144_v37  ;;  %v1149_v55 = vor.u32 %v1148_v44, %v1147_v42  ;;  %v1152_v56 = vor.u32 %v1151_v47, %v1150_v45 }
 0x255   : > { %v1155_v57 = vor.u32 %v1154_v50, %v1153_v48 }
 0x256   : > { %v1161_v58 = vsel %vm1159_vm5, %v1149_v55, 2102212464  ;;  %v1164_v59 = vsel %vm1156_vm4, %v1143_v53, %v1146_v54  ;;  %v1168_v60 = vsel %vm1156_vm4, %v1146_v54, %v1149_v55  ;;  %v1165_v61 = vsel %vm1159_vm5, %v1152_v56, 920167782 }
 0x257   : > { %v1169_v62 = vsel %vm1159_vm5, %v1155_v57, 1326507024  ;;  %v1166_v63 = vsel %vm1158_vm6, %v1149_v55, %v1165_v61  ;;  %v1160_v2 = vsel %vm1156_vm4, %v1140_v32, %v1143_v53  ;;  %v1162_v3 = vsel %vm1158_vm6, %v1146_v54, %v1161_v58 }
 0x258   : > { %v1170_v0 = vsel %vm1158_vm6, %v1152_v56, %v1169_v62  ;;  %v1167_v4 = vsel %vm1157_vm7, %v1164_v59, %v1166_v63  ;;  %v1163_v10 = vsel %vm1157_vm7, %v1160_v2, %v1162_v3  ;;  %vm1216_vm4 = vweird.f32 %v3273_v23 }
 0x259   : > { %v1171_v5 = vsel %vm1157_vm7, %v1168_v60, %v1170_v0  ;;  %v3293_v8 = vmul.u32.u64.low %v1172_v1, %v1167_v4  ;;  %v3294_v9 = vmul.u32.u64.high %v1172_v1, %v1167_v4, %v3293_v8  ;;  %v1179_v12 = vmul.u32 %v1172_v1, %v1163_v10  ;;  %v2300_v0 = vld [vmem:[%s3435_s7 + $0x18] sm:$0xff]  ;;  %v2299_v4 = vld [vmem:[%s3435_s7 + $0x10] sm:$0xff] }
 0x25a   : > { %v3290_v27 = vmul.u32.u64.low %v1172_v1, %v1171_v5  ;;  %v3291_v7 = vmul.u32.u64.high %v1172_v1, %v1171_v5, %v3290_v27  ;;  %v1487_v1 = vld [vmem:[#allocation11 + $0x18] sm:$0xff]  ;;  %v1486_v5 = vld [vmem:[#allocation11 + $0x10] sm:$0xff] }
 0x25b   : > { %v1182_v11 = vadd.s32 1, %v3294_v9  ;;  %v1495_v27 = vld [vmem:[#allocation13 + $0x18] sm:$0xff] }
 0x25c   : > { %vm1181_vm8 = vc.u32 %v3291_v7, %v3293_v8  ;;  %v1180_v26 = vadd.s32 %v3293_v8, %v3291_v7  ;;  %v1497_v7 = vld [vmem:[#allocation14 + $0x10] sm:$0xff] }
 0x25d   : > { %v1183_v13 = vsel %vm1181_vm8, %v1182_v11, %v3294_v9  ;;  %v1494_v8 = vld [vmem:[#allocation13 + $0x10] sm:$0xff]  ;;  %v2284_v9 = vld [vmem:[#allocation10] ss:$0 sm:$0xff]  ;;  %v2298_v11 = vld [vmem:[%s3439_s11] ss:$0 sm:$0xff] }
 0x25e   : > { %v1184_v14 = vadd.s32 %v1183_v13, %v1179_v12 }
 0x260   : > { %v1185_v15 = vadd.s32 536870912, %v1184_v14 }
 0x262   : > { %v1186_v16 = vshrl.u32 %v1185_v15, 30 }
 0x264   : > { %v1187_v18 = vshll.u32 %v1186_v16, 30  ;;  %v1210_v45 = vsub.s32 4, %v1186_v16 }
 0x266   : > { %v1188_v19 = vsub.s32 %v1184_v14, %v1187_v18  ;;  %v1211_v50 = vsel %vm1126_vm10, %v1210_v45, %v1186_v16  ;;  %v966_v16 = vadd.f32 %v2284_v9, %v3268_v17 }
 0x267   : > { %v1213_v51 = vsel %vm1125_vm12, 0, %v1211_v50 }
 0x268   : > { %v1190_v20 = vsub.s32 0, %v1188_v19  ;;  %v1217_v53 = vadd.s32 3, %v1213_v51  ;;  %v1321_v54 = vand.u32 3, %v1213_v51 }
 0x26a   : > { %v2289_v21 = vmin.u32 %v1190_v20, %v1188_v19  ;;  %v1218_v55 = vand.u32 3, %v1217_v53  ;;  %vm1326_vm13 = vcmp.eq.s32.totalorder %v1321_v54, 2  ;;  %vm1323_vm15 = vcmp.eq.s32.totalorder %v1321_v54, 0 }
 0x26b   : > { %vm1322_vm2 = vcmp.lt.s32.totalorder %v1321_v54, 2 }
 0x26c   : > { %v1192_v22 = vclz %v2289_v21  ;;  %vm1223_vm14 = vcmp.eq.s32.totalorder %v1218_v55, 2  ;;  %vm1220_vm1 = vcmp.eq.s32.totalorder %v1218_v55, 0  ;;  %vm1219_vm3 = vcmp.lt.s32.totalorder %v1218_v55, 2  ;;  %v2305_v21 = vld [vmem:[%s3436_s8 + $0x1] ss:$0 sm:$0xff] }
 0x26e   : > { %v2290_v24 = vadd.s32 4294967294, %v1192_v22 }
 0x270   : > { %vm2291_vm9 = vcmp.lt.s32.totalorder %v2290_v24, 0 }
 0x271   : > { %v1195_v25 = vsel %vm2291_vm9, 0, %v2290_v24 }
 0x272   : > { %v1196_v28 = vsub.s32 32, %v1195_v25  ;;  %v1200_v30 = vsub.s32 4294967266, %v1195_v25  ;;  %v1197_v31 = vshll.u32 %v1188_v19, %v1195_v25 }
 0x274   : > { %v1198_v33 = vshrl.u32 %v1180_v26, %v1196_v28  ;;  %v1201_v34 = vadd.s32 127, %v1200_v30 }
 0x276   : > { %v1199_v35 = vor.u32 %v1198_v33, %v1197_v31  ;;  %v1202_v36 = vshll.u32 %v1201_v34, 23 }
 0x278   : > { %v1203_v37 = vor.u32 4788187, %v1202_v36  ;;  %v1206_v41 = vcvt.s32.f32 %v1199_v35 }
 0x27a   : > { %v1204_v39 = vand.u32 2147483647, %v1203_v37 }
 0x27c   : > { %v1207_v42 = vmul.f32 %v1206_v41, %v1204_v39 }
 0x27e   : > { %v1208_v44 = vxor.u32 2147483648, %v1207_v42 }
 0x280   : > { %v1209_v47 = vsel %vm1126_vm10, %v1208_v44, %v1207_v42 }
 0x281   : > { %v1212_v48 = vsel %vm1125_vm12, %v3273_v23, %v1209_v47  ;;  %v1498_v23 = vld [vmem:[#allocation14 + $0x18] sm:$0xff] }
 0x282   : > { %2601 = vcosq.f32 %v1212_v48 }
 0x283   : > { %2603 = vsinq.f32 %v1212_v48 }
 0x28f   : > { %v2602_v56 = vpop.eup %2601 }
 0x290   : > { %v2604_v57 = vpop.eup %2603  ;;  %v1224_v58 = vxor.u32 2147483648, %v2602_v56 }
 0x291   : > { %v1221_v59 = vxor.u32 2147483648, %v2604_v57 }
 0x292   : > { %v1328_v60 = vsel %vm1326_vm13, %v1224_v58, %v2604_v57  ;;  %v1225_v29 = vsel %vm1223_vm14, %v1224_v58, %v2604_v57 }
 0x293   : > { %v1325_v32 = vsel %vm1323_vm15, %v2602_v56, %v1221_v59  ;;  %v1222_v61 = vsel %vm1220_vm1, %v2602_v56, %v1221_v59 }
 0x294   : > { %v1329_v62 = vsel %vm1322_vm2, %v1325_v32, %v1328_v60  ;;  %v1226_v63 = vsel %vm1219_vm3, %v1222_v61, %v1225_v29 }
 0x295   : > { %v1330_v2 = vsel %vm1216_vm4, nan, %v1329_v62  ;;  %v1227_v3 = vsel %vm1216_vm4, nan, %v1226_v63 }
 0x296   : > { %2390 = vmatmul.mubr.msk.f32.vlgmr.msra.gmra.mxu0 %vm812_vm11, %v1330_v2  ;;  %2397 = vmatmul.mubr.msk.f32.vlgmr.msra.gmra.mxu1 %vm812_vm11, %v1227_v3 }
 0x297   : > { %2400 = vmatpush3.msra.mxu0 %v2300_v0  ;;  %2407 = vmatpush3.msra.mxu1 %v1487_v1 }
 0x298   : > { %2401 = vmatprep.subr.mxu0 %v2939_v6  ;;  %2408 = vmatprep.subr.mxu1 %v2939_v6 }
 0x299   : > { %2402 = vmatpush3.msra.mxu0 %v2299_v4  ;;  %2409 = vmatpush3.msra.mxu1 %v1486_v5 }
 0x29a   : > { %2403 = vmatprep.mubr.msk.f32.mxu0 %vm2940_vm0, %v2939_v6  ;;  %2410 = vmatprep.mubr.msk.f32.mxu1 %vm2940_vm0, %v2939_v6 }
 0x29b   : > { %2404 = vmatmul.mubr.msk.f32.vlgmr.msra.gmra.mxu0 %vm812_vm11, %v1330_v2  ;;  %2411 = vmatmul.mubr.msk.f32.vlgmr.msra.gmra.mxu1 %vm812_vm11, %v1227_v3 }
 0x29c   : > { %2413 = vmatprep.subr.mxu0 %v2939_v6  ;;  %2420 = vmatprep.subr.mxu1 %v2939_v6 }
 0x29d   : > { %2417 = vmatprep.mubr.msk.f32.mxu0 %vm2940_vm0, %v2939_v6  ;;  %2424 = vmatprep.mubr.msk.f32.mxu1 %vm2940_vm0, %v2939_v6 }
 0x29e   : > { %2414 = vmatpush3.msra.mxu0 %v1498_v23  ;;  %2421 = vmatpush3.msra.mxu1 %v1495_v27 }
 0x29f   : > { %2415 = vmatprep.subr.mxu0 %v2939_v6  ;;  %2422 = vmatprep.subr.mxu1 %v2939_v6 }
 0x2a0   : > { %2416 = vmatpush3.msra.mxu0 %v1497_v7  ;;  %2423 = vmatpush3.msra.mxu1 %v1494_v8 }
 0x2a1   : > { %2427 = vmatprep.subr.mxu0 %v2939_v6 }
 0x356   : > { %v1400_v10 = vpop.f32.mrf.mxu0  ;;  %v1473_v12 = vpop.f32.mrf.mxu1 }
 0x357   : > { %v1474_v13 = vadd.f32 %v1473_v12, %v1400_v10 }
 0x358   : > { %v2391_v14 = vpop.f32.mrf.mxu0  ;;  %v2398_v15 = vpop.f32.mrf.mxu1 }
 0x359   : > { %v1483_v18 = vadd.f32 %v2298_v11, %v1474_v13 }
 0x35b   : > { %v3334_v19 = vadd.f32 %v1483_v18, %v966_v16  ;;  %v1567_v20 = vpop.f32.mrf.mxu0  ;;  %v1637_v22 = vpop.f32.mrf.mxu1 }
 0x35c   : > { %v1638_v24 = vadd.f32 %v1637_v22, %v1567_v20 }
 0x35d   : > { %v2405_v25 = vpop.f32.mrf.mxu0  ;;  %v2412_v26 = vpop.f32.mrf.mxu1 }
 0x35e   : > { %v3339_v28 = vadd.f32 %v2305_v21, %v1638_v24 }
 0x360   : > { %v1651_v30 = vand.u32 2139095040, %v3339_v28  ;;  %v1648_v17 = vand.u32 2147483647, %v3339_v28  ;;  %vm1650_vm13 = vcmp.lt.s32.totalorder %v3339_v28, 0 }
 0x362   : > { %v1652_v31 = vshrl.u32 %v1651_v30, 23  ;;  %v1655_v37 = vand.u32 8388607, %v1648_v17  ;;  %vm1649_vm14 = vcmp.le.f32.partialorder %v1648_v17, 0.7853982 }
 0x364   : > { %v2306_v33 = vadd.s32 4294967169, %v1652_v31  ;;  %v1656_v56 = vor.u32 8388608, %v1655_v37 }
 0x366   : > { %v1658_v34 = vadd.s32 1, %v2306_v33 }
 0x368   : > { %vm1659_vm5 = vcmp.gt.s32.totalorder %v1658_v34, 0 }
 0x369   : > { %v1660_v35 = vsel %vm1659_vm5, %v1658_v34, 0 }
 0x36a   : > { %v1662_v36 = vand.u32 31, %v1660_v35  ;;  %v1661_v41 = vshrl.u32 %v1660_v35, 5 }
 0x36c   : > { %v1663_v39 = vsub.s32 32, %v1662_v36  ;;  %v1665_v42 = vshll.u32 %v2941_v38, %v1662_v36  ;;  %v1668_v44 = vshll.u32 %v2942_v40, %v1662_v36  ;;  %v1671_v48 = vshll.u32 %v2943_v43, %v1662_v36 }
 0x36d   : > { %v1674_v51 = vshll.u32 %v2944_v46, %v1662_v36  ;;  %v1677_v54 = vshll.u32 %v2945_v49, %v1662_v36  ;;  %vm1680_vm6 = vcmp.lt.s32.totalorder %v1661_v41, 1  ;;  %vm1683_vm7 = vcmp.lt.s32.totalorder %v1661_v41, 4 }
 0x36e   : > { %v1666_v45 = vshrl.u32 %v2942_v40, %v1663_v39  ;;  %v1669_v47 = vshrl.u32 %v2943_v43, %v1663_v39  ;;  %v1672_v50 = vshrl.u32 %v2944_v46, %v1663_v39  ;;  %v1675_v53 = vshrl.u32 %v2945_v49, %v1663_v39 }
 0x36f   : > { %v1678_v55 = vshrl.u32 %v2946_v52, %v1663_v39  ;;  %v1664_v61 = vshrl.u32 %v2941_v38, %v1663_v39  ;;  %vm1682_vm8 = vcmp.lt.s32.totalorder %v1661_v41, 3  ;;  %vm1681_vm9 = vcmp.lt.s32.totalorder %v1661_v41, 2 }
 0x370   : > { %v1667_v57 = vor.u32 %v1666_v45, %v1665_v42  ;;  %v1670_v58 = vor.u32 %v1669_v47, %v1668_v44  ;;  %v1673_v59 = vor.u32 %v1672_v50, %v1671_v48  ;;  %v1676_v60 = vor.u32 %v1675_v53, %v1674_v51 }
 0x371   : > { %v1679_v40 = vor.u32 %v1678_v55, %v1677_v54  ;;  %v1696_v52 = vshll.u32 %v1656_v56, 8 }
 0x372   : > { %v1685_v29 = vsel %vm1683_vm7, %v1673_v59, 2102212464  ;;  %v1688_v43 = vsel %vm1680_vm6, %v1667_v57, %v1670_v58  ;;  %v1692_v32 = vsel %vm1680_vm6, %v1670_v58, %v1673_v59  ;;  %v1689_v46 = vsel %vm1683_vm7, %v1676_v60, 920167782 }
 0x373   : > { %v1693_v62 = vsel %vm1683_vm7, %v1679_v40, 1326507024  ;;  %v1690_v49 = vsel %vm1682_vm8, %v1673_v59, %v1689_v46  ;;  %v1684_v0 = vsel %vm1680_vm6, %v1664_v61, %v1667_v57  ;;  %v1686_v1 = vsel %vm1682_vm8, %v1670_v58, %v1685_v29  ;;  %v2012_v61 = vld [vmem:[#allocation16 + $0x18] sm:$0xff]  ;;  %v2011_v46 = vld [vmem:[#allocation16 + $0x10] sm:$0xff] }
 0x374   : > { %v1694_v63 = vsel %vm1682_vm8, %v1676_v60, %v1693_v62  ;;  %v1691_v2 = vsel %vm1681_vm9, %v1688_v43, %v1690_v49  ;;  %v1687_v7 = vsel %vm1681_vm9, %v1684_v0, %v1686_v1  ;;  %vm1740_vm6 = vweird.f32 %v3339_v28  ;;  %v2009_v62 = vld [vmem:[#allocation16] sm:$0xff] }
 0x375   : > { %v1695_v3 = vsel %vm1681_vm9, %v1692_v32, %v1694_v63  ;;  %v3359_v23 = vmul.u32.u64.low %v1696_v52, %v1691_v2  ;;  %v3360_v27 = vmul.u32.u64.high %v1696_v52, %v1691_v2, %v3359_v23  ;;  %v1703_v8 = vmul.u32 %v1696_v52, %v1687_v7  ;;  %v2316_v63 = vld [vmem:[%s3439_s11 + $0x1] ss:$0 sm:$0xff] }
 0x376   : > { %v3356_v4 = vmul.u32.u64.low %v1696_v52, %v1695_v3  ;;  %v3357_v5 = vmul.u32.u64.high %v1696_v52, %v1695_v3, %v3356_v4 }
 0x377   : > { %v1706_v38 = vadd.s32 1, %v3360_v27 }
 0x378   : > { %vm1705_vm10 = vc.u32 %v3357_v5, %v3359_v23  ;;  %v1704_v22 = vadd.s32 %v3359_v23, %v3357_v5 }
 0x379   : > { %v1707_v9 = vsel %vm1705_vm10, %v1706_v38, %v3360_v27 }
 0x37a   : > { %v1708_v10 = vadd.s32 %v1707_v9, %v1703_v8 }
 0x37c   : > { %v1709_v11 = vadd.s32 536870912, %v1708_v10 }
 0x37e   : > { %v1710_v12 = vshrl.u32 %v1709_v11, 30 }
 0x380   : > { %v1711_v13 = vshll.u32 %v1710_v12, 30  ;;  %v1734_v42 = vsub.s32 4, %v1710_v12 }
 0x382   : > { %v1712_v14 = vsub.s32 %v1708_v10, %v1711_v13  ;;  %v1735_v47 = vsel %vm1650_vm13, %v1734_v42, %v1710_v12 }
 0x383   : > { %v1737_v48 = vsel %vm1649_vm14, 0, %v1735_v47 }
 0x384   : > { %v1714_v15 = vsub.s32 0, %v1712_v14  ;;  %v1741_v50 = vadd.s32 3, %v1737_v48  ;;  %v1845_v51 = vand.u32 3, %v1737_v48 }
 0x386   : > { %v2307_v16 = vmin.u32 %v1714_v15, %v1712_v14  ;;  %v1742_v53 = vand.u32 3, %v1741_v50  ;;  %vm1850_vm15 = vcmp.eq.s32.totalorder %v1845_v51, 2  ;;  %vm1847_vm2 = vcmp.eq.s32.totalorder %v1845_v51, 0 }
 0x387   : > { %vm1846_vm4 = vcmp.lt.s32.totalorder %v1845_v51, 2 }
 0x388   : > { %v1716_v18 = vclz %v2307_v16  ;;  %vm1747_vm1 = vcmp.eq.s32.totalorder %v1742_v53, 2  ;;  %vm1744_vm3 = vcmp.eq.s32.totalorder %v1742_v53, 0  ;;  %vm1743_vm5 = vcmp.lt.s32.totalorder %v1742_v53, 2 }
 0x38a   : > { %v2308_v20 = vadd.s32 4294967294, %v1716_v18 }
 0x38c   : > { %vm2309_vm12 = vcmp.lt.s32.totalorder %v2308_v20, 0 }
 0x38d   : > { %v1719_v21 = vsel %vm2309_vm12, 0, %v2308_v20 }
 0x38e   : > { %v1720_v24 = vsub.s32 32, %v1719_v21  ;;  %v1724_v25 = vsub.s32 4294967266, %v1719_v21  ;;  %v1721_v26 = vshll.u32 %v1712_v14, %v1719_v21 }
 0x390   : > { %v1722_v30 = vshrl.u32 %v1704_v22, %v1720_v24  ;;  %v1725_v31 = vadd.s32 127, %v1724_v25 }
 0x392   : > { %v1723_v33 = vor.u32 %v1722_v30, %v1721_v26  ;;  %v1726_v34 = vshll.u32 %v1725_v31, 23 }
 0x394   : > { %v1727_v35 = vor.u32 4788187, %v1726_v34  ;;  %v1730_v37 = vcvt.s32.f32 %v1723_v33 }
 0x396   : > { %v1728_v36 = vand.u32 2147483647, %v1727_v35 }
 0x398   : > { %v1731_v39 = vmul.f32 %v1730_v37, %v1728_v36 }
 0x39a   : > { %v1732_v41 = vxor.u32 2147483648, %v1731_v39 }
 0x39c   : > { %v1733_v44 = vsel %vm1650_vm13, %v1732_v41, %v1731_v39 }
 0x39d   : > { %v1736_v45 = vsel %vm1649_vm14, %v3339_v28, %v1733_v44  ;;  %v2010_v28 = vld [vmem:[#allocation16 + $0x8] sm:$0xff] }
 0x39e   : > { %2605 = vcosq.f32 %v1736_v45 }
 0x39f   : > { %2607 = vsinq.f32 %v1736_v45 }
 0x3ab   : > { %v2606_v54 = vpop.eup %2605 }
 0x3ac   : > { %v2608_v55 = vpop.eup %2607  ;;  %v1748_v56 = vxor.u32 2147483648, %v2606_v54 }
 0x3ad   : > { %v1745_v57 = vxor.u32 2147483648, %v2608_v55 }
 0x3ae   : > { %v1852_v58 = vsel %vm1850_vm15, %v1748_v56, %v2608_v55  ;;  %v1749_v17 = vsel %vm1747_vm1, %v1748_v56, %v2608_v55 }
 0x3af   : > { %v1849_v59 = vsel %vm1847_vm2, %v2606_v54, %v1745_v57  ;;  %v1746_v60 = vsel %vm1744_vm3, %v2606_v54, %v1745_v57 }
 0x3b0   : > { %v1853_v40 = vsel %vm1846_vm4, %v1849_v59, %v1852_v58  ;;  %v1750_v29 = vsel %vm1743_vm5, %v1746_v60, %v1749_v17 }
 0x3b1   : > { %v1854_v43 = vsel %vm1740_vm6, nan, %v1853_v40  ;;  %v1751_v32 = vsel %vm1740_vm6, nan, %v1750_v29 }
 0x3b2   : > { %2418 = vmatmul.mubr.msk.f32.vlgmr.msra.gmra.mxu0 %vm812_vm11, %v1854_v43  ;;  %2425 = vmatmul.mubr.msk.f32.vlgmr.msra.gmra.mxu1 %vm812_vm11, %v1751_v32 }
 0x3b3   : > { %2435 = vmatprep.mubr.msk.f32.mxu0 %vm2940_vm0, %v2939_v6  ;;  %2428 = vmatpush3.msra.mxu0 %v2012_v61  ;;  %vm2013_vm0 = vcmask 261120  }
 0x3b4   : > { %2429 = vmatprep.subr.mxu0 %v2939_v6 }
 0x3b5   : > { %2430 = vmatpush3.msra.mxu0 %v2011_v46 }
 0x3b6   : > { %2431 = vmatprep.subr.mxu0 %v2939_v6 }
 0x3b7   : > { %2432 = vmatpush3.msra.mxu0 %v2010_v28 }
 0x3b8   : > { %2433 = vmatprep.subr.mxu0 %v2939_v6 }
 0x3b9   : > { %2434 = vmatpush3.msra.mxu0 %v2009_v62 }
 0x472   : > { %v1924_v49 = vpop.f32.mrf.mxu0  ;;  %v1997_v52 = vpop.f32.mrf.mxu1 }
 0x473   : > { %v1998_v0 = vadd.f32 %v1997_v52, %v1924_v49 }
 0x474   : > { %v2419_v1 = vpop.f32.mrf.mxu0  ;;  %v2426_v2 = vpop.f32.mrf.mxu1 }
 0x475   : > { %v2007_v3 = vadd.f32 %v2316_v63, %v1998_v0 }
 0x477   : > { %v2008_v4 = vadd.f32 %v2007_v3, %v3334_v19 }
 0x479   : > { %2436 = vmatmul.mubr.msk.f32.vlgmr.msra.gmra.mxu0 %vm2013_vm0, %v2008_v4 }
 0x539   : > { %v2083_v6 = vpop.f32.mrf.mxu0 }
 0x53a   : > { %2087 = vst [vmem:[%s556_s2] sm:$0xff] %v2083_v6 }
 0x53b   : > { %v2437_v5 = vpop.f32.mrf.mxu0 }
 0x53c   : > { %2856 = shalt.err (!%p2853_p12)
}
 0x53d   : > { %s2857_s16 = scalar_lea.hbm %s3389_s17, 128  ;;  %s2861_s19 = scalar_lea.hbm %s3441_s13, 256 }
 0x53e   : > { %p2858_p10 = scmp.ne.s32.totalorder %s3389_s17, %s2857_s16  ;;  %p2862_p8 = scmp.lt.s32.totalorder %s3389_s17, %s3441_s13 }
 0x53f   : > { %p2863_p7 = scmp.lt.s32.totalorder %s2861_s19, %s2857_s16 }
 0x540   : > { %p2859_p4 = pnand %p2858_p10, %p3056_p5 }
 0x541   : > { %p2864_p11 = por %p2863_p7, %p2862_p8 }
 0x542   : > { %p2860_p9 = pneg %p2859_p4 }
 0x544   : > { %p2865_p13 = pnand %p2864_p11, %p2860_p9 }
 0x546   : > { %2868 = shalt.err (!%p2865_p13)
}
 0x547   : > { %2486 = dma.vmem_to_hbm [thread:$0]  (%p3056_p5), %s3384_s14, 128, %s3389_s17, %s2089_s20  }
 0x548 PF: > { %p2538_p0 = scmp.ge.s32.totalorder %s2923_s28, 2  ;;  %s2114_s24 = sand.u32 1, %s2911_s25  }
 0x549   : > { %s2115_s23 = scalar_lea.sflag [#allocation4], %s2114_s24 }
 0x54a   : > { %p2517_p1 = pnand %p2538_p0, %p3060_p6 }
 0x54c   : > { %p2518_p3 = pneg %p2517_p1 }
 0x54e   : > { %2906 = dma.done.wait (%p2518_p3), %s2115_s23, 128  }
 0x54f   : > { %2908 = vsyncadd (%p2518_p3), %s2115_s23, 4294967168  ;;  %s3474_s28 = sld [smem:[#allocation25_spill]]  ;;  %s3477_s25 = smov %s2915_s26 }
 0x550   : > { %s3475_s29 = sld [smem:[#allocation24_spill]] }
 0x551   : > { %s3476_s27 = sld [smem:[#allocation26_spill]] }
 0x555   : > { %p28_p2 = scmp.ge.s32.totalorder %s3474_s28, 4  }
 0x556   : > { %s3478_s26 = smov %s3475_s29 }
 0x557   :  { %30 = sbr.rel (!%p28_p2) target bundleno = 11 (0xb), region = 150 }
 0x55c   :  { %2120 = vsyncpa [#allocation3], 1 }
 0x55d   :  { %2122 = vsyncpa [#allocation3 + $0x1], 1 }
 0x55e   :  { %2123 = vsyncpa [#allocation6], 1 }
 0x55f   :  { %2124 = vsyncpa [#allocation9], 1 }
 0x560   :  { %2125 = vsyncpa [#allocation12], 1 }
 0x561   :  { %2126 = vsyncpa [#allocation15], 1 }
 0x562   :  { %2127 = vsyncpa [#allocation4], 1 }
 0x563   :  { %2129 = vsyncpa [#allocation4 + $0x1], 1 }

</bundles_post_ra>
